<compile_context>
chip_gen: v7x
topology: tpu7x:2x2x1
jax: 0.10.0
libtpu: 0.0.40
codegen_flags: <defaults>
</compile_context>

<pallas_src>
import jax
import jax.numpy as jnp
from jax.experimental import pallas as pl
from jax.experimental.pallas import tpu as pltpu

BN_EPS = 1e-5


# --------------------------------------------------------------------------
# Kernels
# --------------------------------------------------------------------------
def _conv_stats_kernel(x_ref, w_ref, conv_ref, stats_ref):
    """Phase 1: in-kernel im2col conv + per-image BN partial sums.

    x_ref:     (1, H+2, W+2, C_in)  zero-padded NHWC image (compute dtype)
    w_ref:     (9, C_in, C_PAD)     conv weights, tap-major (compute dtype)
    conv_ref:  (H*W, C_PAD)         conv output tile (conv dtype, lane-dense)
    stats_ref: (1, 2, C_PAD)        f32 per-image [sum, sum-of-squares]
    """
    _, hp, wp, c_in = x_ref.shape
    h, w = hp - 2, wp - 2
    hw, c_pad = conv_ref.shape

    # One aligned full-block load, upcast once; the 9 shifted taps are then
    # static slices of an f32 value (no unaligned packed-dtype ref windows),
    # and the (H, W, C) -> (H*W, C) collapse is a no-op relabeling (W % 8 == 0).
    xf = x_ref[0].astype(jnp.float32)

    acc = jnp.zeros((hw, c_pad), jnp.float32)
    for ky in range(3):
        for kx in range(3):
            xs = xf[ky:ky + h, kx:kx + w, :].reshape(hw, c_in)
            acc = acc + jnp.dot(xs.astype(w_ref.dtype), w_ref[3 * ky + kx],
                                preferred_element_type=jnp.float32)

    conv_ref[...] = acc.astype(conv_ref.dtype)
    # BN partial sums taken from the f32 accumulator (before any bf16 downcast).
    stats_ref[0, 0:1, :] = jnp.sum(acc, axis=0, keepdims=True)
    stats_ref[0, 1:2, :] = jnp.sum(acc * acc, axis=0, keepdims=True)


def _norm_relu_kernel(conv_ref, ss_ref, o_ref):
    """Phase 2: y = relu(conv * scale + shift); BN + affine folded into ss.

    conv_ref: (H*W, C_PAD)   conv dtype (bf16 by default)
    ss_ref:   (2, C_PAD)     f32; row 0 = scale, row 1 = shift
    o_ref:    (H*W, C_PAD)   same dtype/shape as conv_ref (aliased buffer)
    """
    x = conv_ref[...].astype(jnp.float32)
    scale = ss_ref[0:1, :]
    shift = ss_ref[1:2, :]
    o_ref[...] = jnp.maximum(x * scale + shift, 0.0).astype(o_ref.dtype)


# --------------------------------------------------------------------------
# Wrapper glue (layout plumbing + tiny O(C) stats combine)
# --------------------------------------------------------------------------
def _round_up(x, m):
    return ((x + m - 1) // m) * m


def _vmem_limit_bytes():
    # Generation-aware: ~3/4 of physical VMEM, capped at 100 MiB.
    # (128 MiB on v5e/v6e -> ~96 MiB limit; 64 MiB on v7x -> 48 MiB.)
    try:
        cap = pltpu.get_tpu_info().vmem_capacity_bytes
    except Exception:
        cap = 64 * 1024 * 1024
    return int(min(cap * 3 // 4, 100 * 1024 * 1024))


def norm_act_conv(x, w_oihw, bias, gamma, beta, *, data_format="NCHW",
                  compute_dtype=jnp.bfloat16):
    """Forward pass of NormActConv (train-mode BatchNorm).

    x: (N, C_in, H, W) if data_format == "NCHW", else (N, H, W, C_in).
    Returns float32 in the same data_format.
    """
    del bias  # Cancels exactly under train-mode BN: (x+b)-mean(x+b) = x-mean(x).

    if data_format == "NCHW":
        n, c_in, h, w = x.shape
        x_nhwc = jnp.transpose(x.astype(compute_dtype), (0, 2, 3, 1))
    elif data_format == "NHWC":
        n, h, w, c_in = x.shape
        x_nhwc = x.astype(compute_dtype)
    else:
        raise ValueError(f"unknown data_format {data_format!r}")

    c_out, c_in_w, kh, kw = w_oihw.shape
    assert c_in_w == c_in
    if (kh, kw) != (3, 3):
        raise NotImplementedError("only kernel_size=3, stride=1, padding=1")
    if w % 8 != 0:
        # TODO(synk): pad W to a multiple of 8 and mask the extra columns out
        # of the BN statistics.
        raise NotImplementedError("W must be a multiple of 8")

    m = n * h * w
    c_pad = _round_up(c_out, 128)          # lane-dense output channels
    conv_dtype = (jnp.bfloat16 if jnp.dtype(compute_dtype) == jnp.dtype(jnp.bfloat16)
                  else jnp.float32)

    # Spatial halo pad only (1.3x input bytes, vs 9x for wrapper-side im2col).
    xpad = jnp.pad(x_nhwc, ((0, 0), (1, 1), (1, 1), (0, 0)))

    # Weights: OIHW -> (kh*kw, C_in, C_out) tap-major; pad channels to 128.
    w_flat = jnp.transpose(w_oihw, (2, 3, 1, 0)).reshape(kh * kw, c_in, c_out)
    w_flat = jnp.pad(w_flat, ((0, 0), (0, 0), (0, c_pad - c_out)))
    w_flat = w_flat.astype(compute_dtype)

    cparams = pltpu.CompilerParams(
        dimension_semantics=("parallel",),       # independent per-image tiles
        vmem_limit_bytes=_vmem_limit_bytes())

    # ---- phase 1: conv (9 shifted matmuls) + per-image BN partial sums ------
    conv_flat, stats = pl.pallas_call(
        _conv_stats_kernel,
        out_shape=(
            jax.ShapeDtypeStruct((m, c_pad), conv_dtype),
            jax.ShapeDtypeStruct((n, 2, c_pad), jnp.float32),
        ),
        grid=(n,),
        in_specs=[
            pl.BlockSpec((1, h + 2, w + 2, c_in), lambda i: (i, 0, 0, 0)),
            # Constant-index weight block: fetched once (small; kh*kw*C_in*C_PAD).
            pl.BlockSpec((kh * kw, c_in, c_pad), lambda i: (0, 0, 0)),
        ],
        out_specs=(
            pl.BlockSpec((h * w, c_pad), lambda i: (i, 0)),
            pl.BlockSpec((1, 2, c_pad), lambda i: (i, 0, 0)),
        ),
        compiler_params=cparams,
    )(xpad, w_flat)

    # ---- tiny O(C) glue: combine per-image stats, fold BN + affine ----------
    # TODO(synk): one-pass variance can cancel for |mean| >> std at huge M;
    # switch to a centered per-tile combine if that regime ever shows up.
    s = jnp.sum(stats, axis=0)                              # (2, C_PAD) f32
    mean = s[0] / m
    var = jnp.maximum(s[1] / m - mean * mean, 0.0)          # biased var (BN train)
    gamma_pad = jnp.pad(gamma.astype(jnp.float32), (0, c_pad - c_out))
    beta_pad = jnp.pad(beta.astype(jnp.float32), (0, c_pad - c_out))
    scale = gamma_pad * jax.lax.rsqrt(var + BN_EPS)
    shift = beta_pad - mean * scale
    scale_shift = jnp.stack([scale, shift], axis=0)         # (2, C_PAD) f32

    # ---- phase 2: normalize + ReLU (output aliased onto the conv buffer) ----
    out_flat = pl.pallas_call(
        _norm_relu_kernel,
        out_shape=jax.ShapeDtypeStruct((m, c_pad), conv_dtype),
        grid=(n,),
        in_specs=[
            pl.BlockSpec((h * w, c_pad), lambda i: (i, 0)),
            pl.BlockSpec((2, c_pad), lambda i: (0, 0)),
        ],
        out_specs=pl.BlockSpec((h * w, c_pad), lambda i: (i, 0)),
        input_output_aliases={0: 0},
        compiler_params=cparams,
    )(conv_flat, scale_shift)

    out = out_flat[:, :c_out].reshape(n, h, w, c_out).astype(jnp.float32)
    if data_format == "NCHW":
        out = jnp.transpose(out, (0, 3, 1, 2))
    return out


# --------------------------------------------------------------------------
# Reference + test
# --------------------------------------------------------------------------
def _reference(x_nchw, w_oihw, bias, gamma, beta):
    """Plain-JAX reference of the PyTorch forward (train-mode BN, bias kept)."""
    conv = jax.lax.conv_general_dilated(
        x_nchw, w_oihw, window_strides=(1, 1), padding=((1, 1), (1, 1)),
        dimension_numbers=("NCHW", "OIHW", "NCHW"))
    conv = conv + bias.reshape(1, -1, 1, 1)
    mean = conv.mean(axis=(0, 2, 3), keepdims=True)
    var = jnp.square(conv - mean).mean(axis=(0, 2, 3), keepdims=True)
    y = (conv - mean) * jax.lax.rsqrt(var + BN_EPS)
    y = y * gamma.reshape(1, -1, 1, 1) + beta.reshape(1, -1, 1, 1)
    return jnp.maximum(y, 0.0)


if __name__ == "__main__":
    # Shapes consistent with the module: N=2, C_in=4, H=W=16, C_out=8.
    N, C_IN, H, W = 2, 4, 16, 16
    C_OUT = 8

    key = jax.random.PRNGKey(0)
    k1, k2, k3 = jax.random.split(key, 3)
    x = jax.random.normal(k1, (N, C_IN, H, W), dtype=jnp.float32)
    w_conv = jax.random.normal(k2, (C_OUT, C_IN, 3, 3), dtype=jnp.float32) * 0.1
    b_conv = jax.random.normal(k3, (C_OUT,), dtype=jnp.float32) * 0.1
    gamma = 1.0 + 0.1 * jnp.arange(C_OUT, dtype=jnp.float32)
    beta = 0.05 * jnp.arange(C_OUT, dtype=jnp.float32) - 0.2

    # Default (perf) config: bf16-streamed operands + bf16 conv intermediate.
    out_bf16 = jax.block_until_ready(
        jax.jit(norm_act_conv)(x, w_conv, b_conv, gamma, beta))
    # f32 config: tight numerical check against the f32 reference.
    out_f32 = jax.block_until_ready(
        jax.jit(lambda a, b, c, d, e: norm_act_conv(
            a, b, c, d, e, compute_dtype=jnp.float32))(
                x, w_conv, b_conv, gamma, beta))

    ref = _reference(x, w_conv, b_conv, gamma, beta)
    # bf16 path compared against a reference with bf16-rounded x / w (the only
    # extra kernel-side error is the bf16 conv round-trip + bf16 output store).
    ref_bf16 = _reference(x.astype(jnp.bfloat16).astype(jnp.float32),
                          w_conv.astype(jnp.bfloat16).astype(jnp.float32),
                          b_conv, gamma, beta)

    assert out_f32.shape == (N, C_OUT, H, W), out_f32.shape
    assert out_bf16.shape == (N, C_OUT, H, W), out_bf16.shape
    err_f32 = float(jnp.max(jnp.abs(out_f32 - ref)))
    assert jnp.allclose(out_f32, ref, atol=1e-3, rtol=1e-3), err_f32
    err_bf16 = float(jnp.max(jnp.abs(out_bf16 - ref_bf16)))
    assert jnp.allclose(out_bf16, ref_bf16, atol=3e-2, rtol=3e-2), err_bf16

    print("KERNEL_OK")
</pallas_src>

<mosaic_0001>
module attributes {stable_mosaic.version = 11 : i64} {
  func.func @_norm_relu_kernel(%arg0: i32, %arg1: memref<256x128xbf16, #tpu.memory_space<vmem>>, %arg2: memref<2x128xf32, #tpu.memory_space<vmem>>, %arg3: memref<256x128xbf16, #tpu.memory_space<vmem>>) attributes {dimension_semantics = [#tpu.dimension_semantics<parallel>], iteration_bounds = array<i64: 2>, scalar_prefetch = 0 : i64, scratch_operands = 0 : i64, tpu.core_type = #tpu.core_type<tc>, window_params = [{transform_indices = @transform_0, window_bounds = array<i64: 256, 128>}, {pipeline_mode = #tpu.pipeline_mode<synchronous>, transform_indices = @transform_1, window_bounds = array<i64: 2, 128>}, {transform_indices = @transform_2, window_bounds = array<i64: 256, 128>}]} {
    %c0 = arith.constant 0 : index
    %c0_0 = arith.constant 0 : index
    %0 = vector.load %arg1[%c0, %c0_0] : memref<256x128xbf16, #tpu.memory_space<vmem>>, vector<256x128xbf16>
    %1 = arith.extf %0 : vector<256x128xbf16> to vector<256x128xf32>
    %c0_1 = arith.constant 0 : index
    %c0_2 = arith.constant 0 : index
    %2 = vector.load %arg2[%c0_1, %c0_2] : memref<2x128xf32, #tpu.memory_space<vmem>>, vector<1x128xf32>
    %c1 = arith.constant 1 : index
    %c0_3 = arith.constant 0 : index
    %3 = vector.load %arg2[%c1, %c0_3] : memref<2x128xf32, #tpu.memory_space<vmem>>, vector<1x128xf32>
    %4 = vector.broadcast %2 : vector<1x128xf32> to vector<256x128xf32>
    %5 = arith.mulf %1, %4 : vector<256x128xf32>
    %6 = vector.broadcast %3 : vector<1x128xf32> to vector<256x128xf32>
    %7 = arith.addf %5, %6 : vector<256x128xf32>
    %cst = arith.constant 0.000000e+00 : f32
    %8 = vector.broadcast %cst : f32 to vector<256x128xf32>
    %9 = arith.maximumf %7, %8 : vector<256x128xf32>
    %10 = arith.truncf %9 : vector<256x128xf32> to vector<256x128xbf16>
    %c0_4 = arith.constant 0 : index
    %c0_5 = arith.constant 0 : index
    %11 = vector.load %arg3[%c0_4, %c0_5] : memref<256x128xbf16, #tpu.memory_space<vmem>>, vector<256x128xbf16>
    tpu.vector_store %arg3[%c0_4, %c0_5], %10 {strides = array<i32>} : memref<256x128xbf16, #tpu.memory_space<vmem>>, vector<256x128xbf16>,
    return
  }
  func.func @transform_0(%arg0: i32) -> (i32, i32) {
    %c0_i32 = arith.constant 0 : i32
    %c0_i32_0 = arith.constant 0 : i32
    return %arg0, %c0_i32 : i32, i32
  }
  func.func @transform_1(%arg0: i32) -> (i32, i32) {
    %c0_i32 = arith.constant 0 : i32
    %c0_i32_0 = arith.constant 0 : i32
    %c0_i32_1 = arith.constant 0 : i32
    return %c0_i32, %c0_i32_0 : i32, i32
  }
  func.func @transform_2(%arg0: i32) -> (i32, i32) {
    %c0_i32 = arith.constant 0 : i32
    %c0_i32_0 = arith.constant 0 : i32
    return %arg0, %c0_i32 : i32, i32
  }
}

module attributes {stable_mosaic.version = 11 : i64} {
  func.func @_conv_stats_kernel(%arg0: i32, %arg1: memref<1x18x18x4xbf16, #tpu.memory_space<vmem>>, %arg2: memref<9x4x128xbf16, #tpu.memory_space<vmem>>, %arg3: memref<256x128xbf16, #tpu.memory_space<vmem>>, %arg4: memref<1x2x128xf32, #tpu.memory_space<vmem>>) attributes {dimension_semantics = [#tpu.dimension_semantics<parallel>], iteration_bounds = array<i64: 2>, scalar_prefetch = 0 : i64, scratch_operands = 0 : i64, tpu.core_type = #tpu.core_type<tc>, window_params = [{transform_indices = @transform_0, window_bounds = array<i64: 1, 18, 18, 4>}, {pipeline_mode = #tpu.pipeline_mode<synchronous>, transform_indices = @transform_1, window_bounds = array<i64: 9, 4, 128>}, {transform_indices = @transform_2, window_bounds = array<i64: 256, 128>}, {transform_indices = @transform_3, window_bounds = array<i64: 1, 2, 128>}]} {
    %c0 = arith.constant 0 : index
    %c0_0 = arith.constant 0 : index
    %c0_1 = arith.constant 0 : index
    %c0_2 = arith.constant 0 : index
    %0 = vector.load %arg1[%c0, %c0_0, %c0_1, %c0_2] : memref<1x18x18x4xbf16, #tpu.memory_space<vmem>>, vector<1x18x18x4xbf16>
    %1 = vector.shape_cast %0 : vector<1x18x18x4xbf16> to vector<18x18x4xbf16>
    %2 = arith.extf %1 : vector<18x18x4xbf16> to vector<18x18x4xf32>
    %cst = arith.constant 0.000000e+00 : f32
    %3 = vector.broadcast %cst : f32 to vector<256x128xf32>
    %4 = vector.extract_strided_slice %2 {offsets = [0, 0, 0], sizes = [16, 16, 4], strides = [1, 1, 1]} : vector<18x18x4xf32> to vector<16x16x4xf32>
    %5 = vector.shape_cast %4 : vector<16x16x4xf32> to vector<256x4xf32>
    %6 = arith.truncf %5 : vector<256x4xf32> to vector<256x4xbf16>
    %c0_3 = arith.constant 0 : index
    %c0_4 = arith.constant 0 : index
    %c0_5 = arith.constant 0 : index
    %7 = vector.load %arg2[%c0_3, %c0_4, %c0_5] : memref<9x4x128xbf16, #tpu.memory_space<vmem>>, vector<1x4x128xbf16>
    %8 = vector.shape_cast %7 : vector<1x4x128xbf16> to vector<4x128xbf16>
    %cst_6 = arith.constant dense<0.000000e+00> : vector<256x128xf32>
    %9 = tpu.matmul %6, %8, %cst_6 {dimension_numbers = #tpu.dot_dimension_numbers<[1], [0], [0], [1], [0, 0, 1, 1], [], []>} : vector<256x4xbf16>, vector<4x128xbf16>, vector<256x128xf32> -> vector<256x128xf32>
    %10 = arith.addf %3, %9 : vector<256x128xf32>
    %11 = vector.extract_strided_slice %2 {offsets = [0, 1, 0], sizes = [16, 16, 4], strides = [1, 1, 1]} : vector<18x18x4xf32> to vector<16x16x4xf32>
    %12 = vector.shape_cast %11 : vector<16x16x4xf32> to vector<256x4xf32>
    %13 = arith.truncf %12 : vector<256x4xf32> to vector<256x4xbf16>
    %c1 = arith.constant 1 : index
    %c0_7 = arith.constant 0 : index
    %c0_8 = arith.constant 0 : index
    %14 = vector.load %arg2[%c1, %c0_7, %c0_8] : memref<9x4x128xbf16, #tpu.memory_space<vmem>>, vector<1x4x128xbf16>
    %15 = vector.shape_cast %14 : vector<1x4x128xbf16> to vector<4x128xbf16>
    %cst_9 = arith.constant dense<0.000000e+00> : vector<256x128xf32>
    %16 = tpu.matmul %13, %15, %cst_9 {dimension_numbers = #tpu.dot_dimension_numbers<[1], [0], [0], [1], [0, 0, 1, 1], [], []>} : vector<256x4xbf16>, vector<4x128xbf16>, vector<256x128xf32> -> vector<256x128xf32>
    %17 = arith.addf %10, %16 : vector<256x128xf32>
    %18 = vector.extract_strided_slice %2 {offsets = [0, 2, 0], sizes = [16, 16, 4], strides = [1, 1, 1]} : vector<18x18x4xf32> to vector<16x16x4xf32>
    %19 = vector.shape_cast %18 : vector<16x16x4xf32> to vector<256x4xf32>
    %20 = arith.truncf %19 : vector<256x4xf32> to vector<256x4xbf16>
    %c2 = arith.constant 2 : index
    %c0_10 = arith.constant 0 : index
    %c0_11 = arith.constant 0 : index
    %21 = vector.load %arg2[%c2, %c0_10, %c0_11] : memref<9x4x128xbf16, #tpu.memory_space<vmem>>, vector<1x4x128xbf16>
    %22 = vector.shape_cast %21 : vector<1x4x128xbf16> to vector<4x128xbf16>
    %cst_12 = arith.constant dense<0.000000e+00> : vector<256x128xf32>
    %23 = tpu.matmul %20, %22, %cst_12 {dimension_numbers = #tpu.dot_dimension_numbers<[1], [0], [0], [1], [0, 0, 1, 1], [], []>} : vector<256x4xbf16>, vector<4x128xbf16>, vector<256x128xf32> -> vector<256x128xf32>
    %24 = arith.addf %17, %23 : vector<256x128xf32>
    %25 = vector.extract_strided_slice %2 {offsets = [1, 0, 0], sizes = [16, 16, 4], strides = [1, 1, 1]} : vector<18x18x4xf32> to vector<16x16x4xf32>
    %26 = vector.shape_cast %25 : vector<16x16x4xf32> to vector<256x4xf32>
    %27 = arith.truncf %26 : vector<256x4xf32> to vector<256x4xbf16>
    %c3 = arith.constant 3 : index
    %c0_13 = arith.constant 0 : index
    %c0_14 = arith.constant 0 : index
    %28 = vector.load %arg2[%c3, %c0_13, %c0_14] : memref<9x4x128xbf16, #tpu.memory_space<vmem>>, vector<1x4x128xbf16>
    %29 = vector.shape_cast %28 : vector<1x4x128xbf16> to vector<4x128xbf16>
    %cst_15 = arith.constant dense<0.000000e+00> : vector<256x128xf32>
    %30 = tpu.matmul %27, %29, %cst_15 {dimension_numbers = #tpu.dot_dimension_numbers<[1], [0], [0], [1], [0, 0, 1, 1], [], []>} : vector<256x4xbf16>, vector<4x128xbf16>, vector<256x128xf32> -> vector<256x128xf32>
    %31 = arith.addf %24, %30 : vector<256x128xf32>
    %32 = vector.extract_strided_slice %2 {offsets = [1, 1, 0], sizes = [16, 16, 4], strides = [1, 1, 1]} : vector<18x18x4xf32> to vector<16x16x4xf32>
    %33 = vector.shape_cast %32 : vector<16x16x4xf32> to vector<256x4xf32>
    %34 = arith.truncf %33 : vector<256x4xf32> to vector<256x4xbf16>
    %c4 = arith.constant 4 : index
    %c0_16 = arith.constant 0 : index
    %c0_17 = arith.constant 0 : index
    %35 = vector.load %arg2[%c4, %c0_16, %c0_17] : memref<9x4x128xbf16, #tpu.memory_space<vmem>>, vector<1x4x128xbf16>
    %36 = vector.shape_cast %35 : vector<1x4x128xbf16> to vector<4x128xbf16>
    %cst_18 = arith.constant dense<0.000000e+00> : vector<256x128xf32>
    %37 = tpu.matmul %34, %36, %cst_18 {dimension_numbers = #tpu.dot_dimension_numbers<[1], [0], [0], [1], [0, 0, 1, 1], [], []>} : vector<256x4xbf16>, vector<4x128xbf16>, vector<256x128xf32> -> vector<256x128xf32>
    %38 = arith.addf %31, %37 : vector<256x128xf32>
    %39 = vector.extract_strided_slice %2 {offsets = [1, 2, 0], sizes = [16, 16, 4], strides = [1, 1, 1]} : vector<18x18x4xf32> to vector<16x16x4xf32>
    %40 = vector.shape_cast %39 : vector<16x16x4xf32> to vector<256x4xf32>
    %41 = arith.truncf %40 : vector<256x4xf32> to vector<256x4xbf16>
    %c5 = arith.constant 5 : index
    %c0_19 = arith.constant 0 : index
    %c0_20 = arith.constant 0 : index
    %42 = vector.load %arg2[%c5, %c0_19, %c0_20] : memref<9x4x128xbf16, #tpu.memory_space<vmem>>, vector<1x4x128xbf16>
    %43 = vector.shape_cast %42 : vector<1x4x128xbf16> to vector<4x128xbf16>
    %cst_21 = arith.constant dense<0.000000e+00> : vector<256x128xf32>
    %44 = tpu.matmul %41, %43, %cst_21 {dimension_numbers = #tpu.dot_dimension_numbers<[1], [0], [0], [1], [0, 0, 1, 1], [], []>} : vector<256x4xbf16>, vector<4x128xbf16>, vector<256x128xf32> -> vector<256x128xf32>
    %45 = arith.addf %38, %44 : vector<256x128xf32>
    %46 = vector.extract_strided_slice %2 {offsets = [2, 0, 0], sizes = [16, 16, 4], strides = [1, 1, 1]} : vector<18x18x4xf32> to vector<16x16x4xf32>
    %47 = vector.shape_cast %46 : vector<16x16x4xf32> to vector<256x4xf32>
    %48 = arith.truncf %47 : vector<256x4xf32> to vector<256x4xbf16>
    %c6 = arith.constant 6 : index
    %c0_22 = arith.constant 0 : index
    %c0_23 = arith.constant 0 : index
    %49 = vector.load %arg2[%c6, %c0_22, %c0_23] : memref<9x4x128xbf16, #tpu.memory_space<vmem>>, vector<1x4x128xbf16>
    %50 = vector.shape_cast %49 : vector<1x4x128xbf16> to vector<4x128xbf16>
    %cst_24 = arith.constant dense<0.000000e+00> : vector<256x128xf32>
    %51 = tpu.matmul %48, %50, %cst_24 {dimension_numbers = #tpu.dot_dimension_numbers<[1], [0], [0], [1], [0, 0, 1, 1], [], []>} : vector<256x4xbf16>, vector<4x128xbf16>, vector<256x128xf32> -> vector<256x128xf32>
    %52 = arith.addf %45, %51 : vector<256x128xf32>
    %53 = vector.extract_strided_slice %2 {offsets = [2, 1, 0], sizes = [16, 16, 4], strides = [1, 1, 1]} : vector<18x18x4xf32> to vector<16x16x4xf32>
    %54 = vector.shape_cast %53 : vector<16x16x4xf32> to vector<256x4xf32>
    %55 = arith.truncf %54 : vector<256x4xf32> to vector<256x4xbf16>
    %c7 = arith.constant 7 : index
    %c0_25 = arith.constant 0 : index
    %c0_26 = arith.constant 0 : index
    %56 = vector.load %arg2[%c7, %c0_25, %c0_26] : memref<9x4x128xbf16, #tpu.memory_space<vmem>>, vector<1x4x128xbf16>
    %57 = vector.shape_cast %56 : vector<1x4x128xbf16> to vector<4x128xbf16>
    %cst_27 = arith.constant dense<0.000000e+00> : vector<256x128xf32>
    %58 = tpu.matmul %55, %57, %cst_27 {dimension_numbers = #tpu.dot_dimension_numbers<[1], [0], [0], [1], [0, 0, 1, 1], [], []>} : vector<256x4xbf16>, vector<4x128xbf16>, vector<256x128xf32> -> vector<256x128xf32>
    %59 = arith.addf %52, %58 : vector<256x128xf32>
    %60 = vector.extract_strided_slice %2 {offsets = [2, 2, 0], sizes = [16, 16, 4], strides = [1, 1, 1]} : vector<18x18x4xf32> to vector<16x16x4xf32>
    %61 = vector.shape_cast %60 : vector<16x16x4xf32> to vector<256x4xf32>
    %62 = arith.truncf %61 : vector<256x4xf32> to vector<256x4xbf16>
    %c8 = arith.constant 8 : index
    %c0_28 = arith.constant 0 : index
    %c0_29 = arith.constant 0 : index
    %63 = vector.load %arg2[%c8, %c0_28, %c0_29] : memref<9x4x128xbf16, #tpu.memory_space<vmem>>, vector<1x4x128xbf16>
    %64 = vector.shape_cast %63 : vector<1x4x128xbf16> to vector<4x128xbf16>
    %cst_30 = arith.constant dense<0.000000e+00> : vector<256x128xf32>
    %65 = tpu.matmul %62, %64, %cst_30 {dimension_numbers = #tpu.dot_dimension_numbers<[1], [0], [0], [1], [0, 0, 1, 1], [], []>} : vector<256x4xbf16>, vector<4x128xbf16>, vector<256x128xf32> -> vector<256x128xf32>
    %66 = arith.addf %59, %65 : vector<256x128xf32>
    %67 = arith.truncf %66 : vector<256x128xf32> to vector<256x128xbf16>
    %c0_31 = arith.constant 0 : index
    %c0_32 = arith.constant 0 : index
    %68 = vector.load %arg3[%c0_31, %c0_32] : memref<256x128xbf16, #tpu.memory_space<vmem>>, vector<256x128xbf16>
    tpu.vector_store %arg3[%c0_31, %c0_32], %67 {strides = array<i32>} : memref<256x128xbf16, #tpu.memory_space<vmem>>, vector<256x128xbf16>,
    %cst_33 = arith.constant dense<0.000000e+00> : vector<128xf32>
    %69 = vector.multi_reduction <add>, %66, %cst_33 [0] : vector<256x128xf32> to vector<128xf32>
    %70 = vector.shape_cast %69 : vector<128xf32> to vector<1x128xf32>
    %c0_34 = arith.constant 0 : index
    %c0_35 = arith.constant 0 : index
    %c0_36 = arith.constant 0 : index
    %71 = vector.load %arg4[%c0_34, %c0_35, %c0_36] : memref<1x2x128xf32, #tpu.memory_space<vmem>>, vector<1x1x128xf32>
    %72 = vector.shape_cast %71 : vector<1x1x128xf32> to vector<1x128xf32>
    %73 = vector.shape_cast %70 : vector<1x128xf32> to vector<1x1x128xf32>
    tpu.vector_store %arg4[%c0_34, %c0_35, %c0_36], %73 {strides = array<i32>} : memref<1x2x128xf32, #tpu.memory_space<vmem>>, vector<1x1x128xf32>,
    %74 = arith.mulf %66, %66 : vector<256x128xf32>
    %cst_37 = arith.constant dense<0.000000e+00> : vector<128xf32>
    %75 = vector.multi_reduction <add>, %74, %cst_37 [0] : vector<256x128xf32> to vector<128xf32>
    %76 = vector.shape_cast %75 : vector<128xf32> to vector<1x128xf32>
    %c0_38 = arith.constant 0 : index
    %c1_39 = arith.constant 1 : index
    %c0_40 = arith.constant 0 : index
    %77 = vector.load %arg4[%c0_38, %c1_39, %c0_40] : memref<1x2x128xf32, #tpu.memory_space<vmem>>, vector<1x1x128xf32>
    %78 = vector.shape_cast %77 : vector<1x1x128xf32> to vector<1x128xf32>
    %79 = vector.shape_cast %76 : vector<1x128xf32> to vector<1x1x128xf32>
    tpu.vector_store %arg4[%c0_38, %c1_39, %c0_40], %79 {strides = array<i32>} : memref<1x2x128xf32, #tpu.memory_space<vmem>>, vector<1x1x128xf32>,
    return
  }
  func.func @transform_0(%arg0: i32) -> (i32, i32, i32, i32) {
    %c0_i32 = arith.constant 0 : i32
    %c0_i32_0 = arith.constant 0 : i32
    %c0_i32_1 = arith.constant 0 : i32
    %c0_i32_2 = arith.constant 0 : i32
    return %arg0, %c0_i32, %c0_i32_0, %c0_i32_1 : i32, i32, i32, i32
  }
  func.func @transform_1(%arg0: i32) -> (i32, i32, i32) {
    %c0_i32 = arith.constant 0 : i32
    %c0_i32_0 = arith.constant 0 : i32
    %c0_i32_1 = arith.constant 0 : i32
    %c0_i32_2 = arith.constant 0 : i32
    return %c0_i32, %c0_i32_0, %c0_i32_1 : i32, i32, i32
  }
  func.func @transform_2(%arg0: i32) -> (i32, i32) {
    %c0_i32 = arith.constant 0 : i32
    %c0_i32_0 = arith.constant 0 : i32
    return %arg0, %c0_i32 : i32, i32
  }
  func.func @transform_3(%arg0: i32) -> (i32, i32, i32) {
    %c0_i32 = arith.constant 0 : i32
    %c0_i32_0 = arith.constant 0 : i32
    %c0_i32_1 = arith.constant 0 : i32
    return %arg0, %c0_i32, %c0_i32_0 : i32, i32, i32
  }
}

</mosaic_0001>

<bundles_post_ra>
// kernel: norm_act_conv.3
= control target key start
LH: loop header
LB: loop body
LE: loop exit
PB: predicated region body
PF: predicated region fallthrough
CT: control target
= control target key end

     0   :  { %s815_s9 = smov 0   ;;  %s957_s0 = inlined_call_operand.vmem [shape: bf16[512,128], index: 0, kind: input, shape index: {}, may-alias: {0,2}]   ;;  %s958_s1 = inlined_call_operand.vmem [shape: f32[2,128], index: 1, kind: input, shape index: {}]   ;;  %s959_s2 = inlined_call_operand.vmem [shape: bf16[512,128], index: 2, kind: output, shape index: {}, may-alias: {0,2}]  }
   0x1 LB: > { %s533_s10 = sadd.s32 4294967295, %s798_s9   ;;  %p537_p0 = scmp.ge.s32.totalorder %s798_s9, 1  ;;  %s798_s9 = sphi %s815_s9, %s12_s9  }
   0x2   : > { %p113_p1 = scmp.lt.s32.totalorder %s798_s9, 3 }
   0x4   : > { %p114_p2 = pnand %p537_p0, %p113_p1 }
   0x5   : > { %s538_s11 = sshll.u32 (!%p114_p2), %s533_s10, 5  ;;  %v542_v40 = vld [vmem:[%s958_s1] ss:$0 sm:$0xff] (!%p114_p2) }
   0x6   : > { %117 = sbr.rel (%p114_p2) target bundleno = 57 (0x39), region = 28  ;;  %p136_p3 = scmp.lt.s32.totalorder (!%p114_p2), %s538_s11, 63 }
   0xd   : > { %s961_s11 = smov (!%p136_p3, %s538_s11), 63 }
   0xe   : > { %s539_s12 = sshll.u32 %s961_s11, 2 }
   0xf   : > { %s831_s15 = scalar_lea.vmem %s957_s0, %s539_s12  ;;  %s898_s22 = scalar_lea.vmem %s959_s2, %s539_s12 }
  0x10   : > { %v611_v0 = vld [vmem:[%s831_s15] sm:$0xff]   ;;  %v754_v1 = vld [vmem:[%s831_s15 + $0x8] sm:$0xff]   ;;  %v755_v2 = vld [vmem:[%s831_s15 + $0x10] sm:$0xff]  }
  0x11   : > { %v612_v3 = vunpack.c.l.bf16 %v611_v0  ;;  %v613_v4 = vunpack.c.h.bf16 %v611_v0  ;;  %v616_v5 = vunpack.c.l.bf16 %v754_v1  ;;  %v617_v6 = vunpack.c.h.bf16 %v754_v1  ;;  %v756_v7 = vld [vmem:[%s831_s15 + $0x18] sm:$0xff]   ;;  %v757_v8 = vld [vmem:[%s831_s15 + $0x20] sm:$0xff]   ;;  %v758_v9 = vld [vmem:[%s831_s15 + $0x28] sm:$0xff]  }
  0x12   : > { %v620_v10 = vunpack.c.l.bf16 %v755_v2  ;;  %v621_v11 = vunpack.c.h.bf16 %v755_v2  ;;  %v624_v12 = vunpack.c.l.bf16 %v756_v7  ;;  %v625_v13 = vunpack.c.h.bf16 %v756_v7  ;;  %v759_v14 = vld [vmem:[%s831_s15 + $0x30] sm:$0xff]   ;;  %v760_v15 = vld [vmem:[%s831_s15 + $0x38] sm:$0xff]   ;;  %v761_v16 = vld [vmem:[%s831_s15 + $0x40] sm:$0xff]  }
  0x13   : > { %v628_v17 = vunpack.c.l.bf16 %v757_v8  ;;  %v629_v18 = vunpack.c.h.bf16 %v757_v8  ;;  %v632_v19 = vunpack.c.l.bf16 %v758_v9  ;;  %v633_v20 = vunpack.c.h.bf16 %v758_v9  ;;  %v762_v21 = vld [vmem:[%s831_s15 + $0x48] sm:$0xff]   ;;  %v763_v22 = vld [vmem:[%s831_s15 + $0x50] sm:$0xff]   ;;  %v764_v23 = vld [vmem:[%s831_s15 + $0x58] sm:$0xff]  }
  0x14   : > { %v636_v24 = vunpack.c.l.bf16 %v759_v14  ;;  %v637_v25 = vunpack.c.h.bf16 %v759_v14  ;;  %v640_v26 = vunpack.c.l.bf16 %v760_v15  ;;  %v641_v27 = vunpack.c.h.bf16 %v760_v15  ;;  %v765_v28 = vld [vmem:[%s831_s15 + $0x60] sm:$0xff]   ;;  %v766_v29 = vld [vmem:[%s831_s15 + $0x68] sm:$0xff]   ;;  %v767_v34 = vld [vmem:[%s831_s15 + $0x70] sm:$0xff]  }
  0x15   : > { %v644_v30 = vunpack.c.l.bf16 %v761_v16  ;;  %v645_v31 = vunpack.c.h.bf16 %v761_v16  ;;  %v648_v32 = vunpack.c.l.bf16 %v762_v21  ;;  %v649_v33 = vunpack.c.h.bf16 %v762_v21  ;;  %v768_v35 = vld [vmem:[%s831_s15 + $0x78] sm:$0xff]  }
  0x16   : > { %v652_v36 = vunpack.c.l.bf16 %v763_v22  ;;  %v653_v37 = vunpack.c.h.bf16 %v763_v22  ;;  %v656_v38 = vunpack.c.l.bf16 %v764_v23  ;;  %v657_v39 = vunpack.c.h.bf16 %v764_v23 }
  0x17   : > { %v660_v41 = vunpack.c.l.bf16 %v765_v28  ;;  %v661_v42 = vunpack.c.h.bf16 %v765_v28  ;;  %v664_v43 = vunpack.c.l.bf16 %v766_v29  ;;  %v665_v44 = vunpack.c.h.bf16 %v766_v29 }
  0x18   : > { %v668_v45 = vunpack.c.l.bf16 %v767_v34  ;;  %v669_v46 = vunpack.c.h.bf16 %v767_v34  ;;  %v672_v47 = vunpack.c.l.bf16 %v768_v35  ;;  %v673_v48 = vunpack.c.h.bf16 %v768_v35 }
  0x19   : > { %v217_v49 = vmul.f32 %v612_v3, %v542_v40  ;;  %v218_v50 = vmul.f32 %v613_v4, %v542_v40  ;;  %v219_v51 = vmul.f32 %v616_v5, %v542_v40  ;;  %v220_v52 = vmul.f32 %v617_v6, %v542_v40  ;;  %v859_v4 = vld [vmem:[%s958_s1 + $0x1] ss:$0 sm:$0xff] }
  0x1a   : > { %v221_v53 = vmul.f32 %v620_v10, %v542_v40  ;;  %v222_v54 = vmul.f32 %v621_v11, %v542_v40  ;;  %v223_v55 = vmul.f32 %v624_v12, %v542_v40  ;;  %v224_v56 = vmul.f32 %v625_v13, %v542_v40 }
  0x1b   : > { %v225_v57 = vmul.f32 %v628_v17, %v542_v40  ;;  %v226_v58 = vmul.f32 %v629_v18, %v542_v40  ;;  %v227_v59 = vmul.f32 %v632_v19, %v542_v40  ;;  %v228_v60 = vmul.f32 %v633_v20, %v542_v40 }
  0x1c   : > { %v229_v61 = vmul.f32 %v636_v24, %v542_v40  ;;  %v230_v62 = vmul.f32 %v637_v25, %v542_v40  ;;  %v231_v63 = vmul.f32 %v640_v26, %v542_v40  ;;  %v232_v0 = vmul.f32 %v641_v27, %v542_v40 }
  0x1d   : > { %v233_v1 = vmul.f32 %v644_v30, %v542_v40  ;;  %v234_v2 = vmul.f32 %v645_v31, %v542_v40  ;;  %v852_v7 = vmul.f32 %v648_v32, %v542_v40  ;;  %v854_v3 = vmul.f32 %v649_v33, %v542_v40 }
  0x1e   : > { %v861_v5 = vmul.f32 %v652_v36, %v542_v40  ;;  %v863_v6 = vmul.f32 %v653_v37, %v542_v40  ;;  %v865_v8 = vmul.f32 %v656_v38, %v542_v40  ;;  %v867_v9 = vmul.f32 %v657_v39, %v542_v40 }
  0x1f   : > { %v869_v10 = vmul.f32 %v660_v41, %v542_v40  ;;  %v871_v11 = vmul.f32 %v661_v42, %v542_v40  ;;  %v873_v12 = vmul.f32 %v664_v43, %v542_v40  ;;  %v875_v13 = vmul.f32 %v665_v44, %v542_v40 }
  0x20   : > { %v877_v14 = vmul.f32 %v668_v45, %v542_v40  ;;  %v879_v15 = vmul.f32 %v669_v46, %v542_v40  ;;  %v881_v16 = vmul.f32 %v672_v47, %v542_v40  ;;  %v883_v17 = vmul.f32 %v673_v48, %v542_v40 }
  0x21   : > { %v253_v18 = vadd.f32 %v859_v4, %v217_v49  ;;  %v254_v19 = vadd.f32 %v859_v4, %v218_v50  ;;  %v255_v20 = vadd.f32 %v859_v4, %v219_v51  ;;  %v256_v21 = vadd.f32 %v859_v4, %v220_v52 }
  0x22   : > { %v257_v22 = vadd.f32 %v859_v4, %v221_v53  ;;  %v258_v23 = vadd.f32 %v859_v4, %v222_v54  ;;  %v259_v24 = vadd.f32 %v859_v4, %v223_v55  ;;  %v260_v25 = vadd.f32 %v859_v4, %v224_v56 }
  0x23   : > { %v285_v26 = vmax.f32 %v253_v18, 0.0  ;;  %v286_v27 = vmax.f32 %v254_v19, 0.0  ;;  %v287_v28 = vmax.f32 %v255_v20, 0.0  ;;  %v288_v29 = vmax.f32 %v256_v21, 0.0 }
  0x24   : > { %v289_v30 = vmax.f32 %v257_v22, 0.0  ;;  %v290_v31 = vmax.f32 %v258_v23, 0.0  ;;  %v291_v32 = vmax.f32 %v259_v24, 0.0  ;;  %v292_v33 = vmax.f32 %v260_v25, 0.0 }
  0x25   : > { %v677_v34 = vpack.c.bf16 %v286_v27, %v285_v26  ;;  %v682_v35 = vpack.c.bf16 %v288_v29, %v287_v28  ;;  %v261_v36 = vadd.f32 %v859_v4, %v225_v57  ;;  %v262_v37 = vadd.f32 %v859_v4, %v226_v58 }
  0x26   : > { %v687_v38 = vpack.c.bf16 %v290_v31, %v289_v30  ;;  %v692_v39 = vpack.c.bf16 %v292_v33, %v291_v32  ;;  %v263_v40 = vadd.f32 %v859_v4, %v227_v59  ;;  %v264_v41 = vadd.f32 %v859_v4, %v228_v60 }
  0x27   : > { %678 = vst [vmem:[%s898_s22] sm:$0xff] %v677_v34   ;;  %769 = vst [vmem:[%s898_s22 + $0x8] sm:$0xff] %v682_v35   ;;  %v293_v42 = vmax.f32 %v261_v36, 0.0  ;;  %v294_v43 = vmax.f32 %v262_v37, 0.0  ;;  %v265_v44 = vadd.f32 %v859_v4, %v229_v61  ;;  %v266_v45 = vadd.f32 %v859_v4, %v230_v62 }
  0x28   : > { %770 = vst [vmem:[%s898_s22 + $0x10] sm:$0xff] %v687_v38   ;;  %771 = vst [vmem:[%s898_s22 + $0x18] sm:$0xff] %v692_v39   ;;  %v295_v46 = vmax.f32 %v263_v40, 0.0  ;;  %v296_v47 = vmax.f32 %v264_v41, 0.0  ;;  %v267_v48 = vadd.f32 %v859_v4, %v231_v63  ;;  %v268_v49 = vadd.f32 %v859_v4, %v232_v0 }
  0x29   : > { %v697_v50 = vpack.c.bf16 %v294_v43, %v293_v42  ;;  %v297_v51 = vmax.f32 %v265_v44, 0.0  ;;  %v298_v52 = vmax.f32 %v266_v45, 0.0  ;;  %v269_v53 = vadd.f32 %v859_v4, %v233_v1 }
  0x2a   : > { %v702_v54 = vpack.c.bf16 %v296_v47, %v295_v46  ;;  %v299_v55 = vmax.f32 %v267_v48, 0.0  ;;  %v300_v56 = vmax.f32 %v268_v49, 0.0  ;;  %v270_v57 = vadd.f32 %v859_v4, %v234_v2 }
  0x2b   : > { %772 = vst [vmem:[%s898_s22 + $0x20] sm:$0xff] %v697_v50   ;;  %v707_v58 = vpack.c.bf16 %v298_v52, %v297_v51  ;;  %v301_v59 = vmax.f32 %v269_v53, 0.0  ;;  %v271_v60 = vadd.f32 %v859_v4, %v852_v7  ;;  %v272_v61 = vadd.f32 %v859_v4, %v854_v3 }
  0x2c   : > { %773 = vst [vmem:[%s898_s22 + $0x28] sm:$0xff] %v702_v54   ;;  %v712_v62 = vpack.c.bf16 %v300_v56, %v299_v55  ;;  %v302_v63 = vmax.f32 %v270_v57, 0.0  ;;  %v273_v0 = vadd.f32 %v859_v4, %v861_v5  ;;  %v274_v1 = vadd.f32 %v859_v4, %v863_v6 }
  0x2d   : > { %774 = vst [vmem:[%s898_s22 + $0x30] sm:$0xff] %v707_v58   ;;  %v303_v2 = vmax.f32 %v271_v60, 0.0  ;;  %v304_v18 = vmax.f32 %v272_v61, 0.0  ;;  %v275_v19 = vadd.f32 %v859_v4, %v865_v8  ;;  %v276_v7 = vadd.f32 %v859_v4, %v867_v9 }
  0x2e   : > { %775 = vst [vmem:[%s898_s22 + $0x38] sm:$0xff] %v712_v62   ;;  %v717_v3 = vpack.c.bf16 %v302_v63, %v301_v59  ;;  %v305_v20 = vmax.f32 %v273_v0, 0.0  ;;  %v306_v21 = vmax.f32 %v274_v1, 0.0  ;;  %v277_v5 = vadd.f32 %v859_v4, %v869_v10 }
  0x2f   : > { %v722_v22 = vpack.c.bf16 %v304_v18, %v303_v2  ;;  %v307_v6 = vmax.f32 %v275_v19, 0.0  ;;  %v308_v23 = vmax.f32 %v276_v7, 0.0  ;;  %v278_v24 = vadd.f32 %v859_v4, %v871_v11 }
  0x30   : > { %776 = vst [vmem:[%s898_s22 + $0x40] sm:$0xff] %v717_v3   ;;  %v727_v8 = vpack.c.bf16 %v306_v21, %v305_v20  ;;  %v309_v25 = vmax.f32 %v277_v5, 0.0  ;;  %v279_v9 = vadd.f32 %v859_v4, %v873_v12  ;;  %v280_v26 = vadd.f32 %v859_v4, %v875_v13 }
  0x31   : > { %777 = vst [vmem:[%s898_s22 + $0x48] sm:$0xff] %v722_v22   ;;  %v732_v27 = vpack.c.bf16 %v308_v23, %v307_v6  ;;  %v310_v10 = vmax.f32 %v278_v24, 0.0  ;;  %v281_v28 = vadd.f32 %v859_v4, %v877_v14  ;;  %v282_v11 = vadd.f32 %v859_v4, %v879_v15 }
  0x32   : > { %778 = vst [vmem:[%s898_s22 + $0x50] sm:$0xff] %v727_v8   ;;  %v311_v29 = vmax.f32 %v279_v9, 0.0  ;;  %v312_v30 = vmax.f32 %v280_v26, 0.0  ;;  %v283_v12 = vadd.f32 %v859_v4, %v881_v16  ;;  %v284_v13 = vadd.f32 %v859_v4, %v883_v17 }
  0x33   : > { %779 = vst [vmem:[%s898_s22 + $0x58] sm:$0xff] %v732_v27   ;;  %v737_v31 = vpack.c.bf16 %v310_v10, %v309_v25  ;;  %v313_v32 = vmax.f32 %v281_v28, 0.0  ;;  %v314_v33 = vmax.f32 %v282_v11, 0.0 }
  0x34   : > { %v742_v14 = vpack.c.bf16 %v312_v30, %v311_v29  ;;  %v315_v34 = vmax.f32 %v283_v12, 0.0  ;;  %v316_v35 = vmax.f32 %v284_v13, 0.0 }
  0x35   : > { %780 = vst [vmem:[%s898_s22 + $0x60] sm:$0xff] %v737_v31   ;;  %v747_v15 = vpack.c.bf16 %v314_v33, %v313_v32 }
  0x36   : > { %781 = vst [vmem:[%s898_s22 + $0x68] sm:$0xff] %v742_v14   ;;  %v752_v36 = vpack.c.bf16 %v316_v35, %v315_v34 }
  0x37   : > { %782 = vst [vmem:[%s898_s22 + $0x70] sm:$0xff] %v747_v15  }
  0x38   : > { %783 = vst [vmem:[%s898_s22 + $0x78] sm:$0xff] %v752_v36  }
  0x39 PF: > { %s12_s9 = sadd.s32 1, %s798_s9  }
  0x3a   : > { %p9_p4 = scmp.ge.s32.totalorder %s12_s9, 4  }
  0x3c   :  { %11 = sbr.rel (!%p9_p4) target bundleno = 1 (0x1), region = 58 }

// kernel: norm_act_conv.2
= control target key start
LH: loop header
LB: loop body
LE: loop exit
PB: predicated region body
PF: predicated region fallthrough
CT: control target
= control target key end

     0   :  { %s4030_s12 = smov 0   ;;  %s4942_s0 = inlined_call_operand.vmem [shape: bf16[2,18,18,4], index: 0, kind: input, shape index: {}]   ;;  %s4943_s1 = inlined_call_operand.vmem [shape: bf16[9,4,128], index: 1, kind: input, shape index: {}]   ;;  %s4944_s2 = inlined_call_operand.vmem [shape: bf16[512,128], index: 2, kind: output, shape index: {0}]   ;;  %s4945_s3 = inlined_call_operand.vmem [shape: f32[2,2,128], index: 3, kind: output, shape index: {1}]  }
   0x1 LB: > { %s4036_s13 = sadd.s32 4294967295, %s4008_s12   ;;  %p2894_p0 = scmp.ge.s32.totalorder %s4008_s12, 1  ;;  %s4008_s12 = sphi %s4030_s12, %s14_s12  }
   0x2   : > { %p140_p1 = scmp.lt.s32.totalorder %s4008_s12, 3 }
   0x4   : > { %p141_p2 = pnand %p2894_p0, %p140_p1 }
   0x6   : > { %144 = sbr.rel (%p141_p2) target bundleno = 550 (0x226), region = 28 }
   0xd   : > { %v2915_v0 = vld [vmem:[%s4943_s1 + $0x2] sm:$0x3]  ;;  %vm537_vm0 = vcmask 1041408   ;;  %v4046_v1 = vld [vmem:[%s4943_s1 + $0x8] sm:$0x3]  ;;  %p168_p3 = scmp.lt.s32.totalorder %s4036_s13, 1 }
   0xe   : > { %3947 = vmatprep.subr.msk.bf16.mxu1 %vm537_vm0, %v2915_v0  ;;  %3951 = vmatprep.subr.msk.bf16.mxu0 %vm537_vm0, %v4046_v1  ;;  %v539_v2 = vsel %vm537_vm0, %v2915_v0, 0  ;;  %v4055_v3 = vsel %vm537_vm0, %v4046_v1, 0  ;;  %v308_v4 = vld [vmem:[%s4943_s1] sm:$0x3]  ;;  %v3000_v5 = vld [vmem:[%s4943_s1 + $0xa] sm:$0x3] }
   0xf   : > { %4984 = vst [vmem:[#allocation2_spill] sm:$0xff] %v4055_v3  ;;  %3384 = vmatpush3.bf16.msra.mxu1 %v539_v2  ;;  %3520 = vmatpush3.bf16.msra.mxu0 %v4055_v3  ;;  %s4062_s20 = scalar_select %p168_p3, %s4036_s13, 1  ;;  %vm357_vm1 = vcmask 1046528   ;;  %vm488_vm2 = vcmask 31744   ;;  %v751_v37 = vsel %vm537_vm0, %v308_v4, 0  ;;  %v1717_v43 = vsel %vm537_vm0, %v3000_v5, 0 }
  0x10   : > { %3948 = vmatprep.subr.msk.bf16.mxu1 %vm537_vm0, %v308_v4  ;;  %3953 = vmatprep.subr.msk.bf16.mxu0 %vm537_vm0, %v3000_v5  ;;  %v4144_v44 = vld [vmem:[%s4943_s1 + $0x4] sm:$0x3]  ;;  %v4188_v2 = vld [vmem:[%s4943_s1 + $0xc] sm:$0x3]  ;;  %vm914_vm3 = vcmask 1045504   ;;  %s2896_s10 = sshll.u32 %s4036_s13, 5 }
  0x11   : > { %s3957_s23 = smul.u32 216, %s4062_s20  ;;  %p174_p4 = scmp.lt.s32.totalorder %s2896_s10, 63 }
  0x12   : > { %s2898_s13 = sshll.u32 %s4062_s20, 1 }
  0x13   : > { %s4073_s26 = scalar_lea.vmem %s4942_s0, %s3957_s23  ;;  %s5026_s10 = smov (!%p174_p4, %s2896_s10), 63 }
  0x14   : > { %v4076_v6 = vld [vmem:[%s4073_s26] sm:$0xff]   ;;  %v4079_v7 = vld [vmem:[%s4073_s26 + $0x8] sm:$0x1]  ;;  %v4082_v8 = vld [vmem:[%s4073_s26 + $0xc] sm:$0xff]   ;;  %s2897_s11 = sshll.u32 %s5026_s10, 2  ;;  %s182_s19 = scalar_lea.vmem %s4945_s3, %s2898_s13 }
  0x15   : > { %v4948_v9 = vunpack.c.l.bf16 %v4076_v6  ;;  %v4947_v10 = vunpack.c.h.bf16 %v4076_v6  ;;  %v4946_v11 = vunpack.c.l.bf16 %v4079_v7  ;;  %v4088_v12 = vld [vmem:[%s4073_s26 + $0x14] sm:$0x1]  ;;  %v241_v13 = vunpack.c.l.bf16 %v4082_v8  ;;  %v4092_v14 = vld [vmem:[%s4073_s26 + $0x18] sm:$0xff]   ;;  %v4108_v23 = vld [vmem:[%s4073_s26 + $0x20] sm:$0x1]  ;;  %s4912_s16 = scalar_lea.vmem %s4944_s2, %s2897_s11 }
  0x16   : > { %v242_v15 = vunpack.c.h.bf16 %v4082_v8  ;;  %v243_v16 = vunpack.c.l.bf16 %v4088_v12  ;;  %v244_v20 = vunpack.c.l.bf16 %v4092_v14  ;;  %v4115_v27 = vld [vmem:[%s4073_s26 + $0x24] sm:$0xff]   ;;  %v245_v31 = vunpack.c.h.bf16 %v4092_v14  ;;  %v4124_v34 = vld [vmem:[%s4073_s26 + $0x2c] sm:$0x1]  ;;  %v4127_v35 = vld [vmem:[%s4073_s26 + $0x30] sm:$0xff]  }
  0x17   : > { %v358_v17 = vrot.slane %v4948_v9, 1  ;;  %v359_v18 = vrot.slane %v4947_v10, 1  ;;  %v361_v19 = vrot.slane %v4946_v11, 1  ;;  %v363_v21 = vrot.slane %v241_v13, 1  ;;  %v4134_v40 = vld [vmem:[%s4073_s26 + $0x38] sm:$0x1] }
  0x18   : > { %v364_v22 = vrot.slane %v242_v15, 1  ;;  %v366_v26 = vrot.slane %v243_v16, 1  ;;  %v246_v32 = vunpack.c.l.bf16 %v4108_v23  ;;  %v368_v33 = vrot.slane %v244_v20, 1  ;;  %v4155_v49 = vld [vmem:[%s4073_s26 + $0x3c] sm:$0xff]   ;;  %v4162_v54 = vld [vmem:[%s4073_s26 + $0x44] sm:$0x1] }
  0x19   : > { %v360_v24 = vsel %vm357_vm1, %v358_v17, %v359_v18  ;;  %v362_v25 = vsel %vm357_vm1, %v359_v18, %v361_v19  ;;  %v247_v38 = vunpack.c.l.bf16 %v4115_v27  ;;  %v248_v39 = vunpack.c.h.bf16 %v4115_v27  ;;  %v4165_v55 = vld [vmem:[%s4073_s26 + $0x48] sm:$0xff]   ;;  %v4183_v0 = vld [vmem:[%s4073_s26 + $0x50] sm:$0x1]  ;;  %v4199_v19 = vld [vmem:[%s4073_s26 + $0x54] sm:$0xff]  }
  0x1a   : > { %v470_v28 = vpack.c.bf16 %v362_v25, %v360_v24  ;;  %v365_v29 = vsel %vm357_vm1, %v363_v21, %v364_v22  ;;  %v367_v30 = vsel %vm357_vm1, %v364_v22, %v366_v26  ;;  %v369_v41 = vrot.slane %v245_v31, 1  ;;  %v4208_v26 = vld [vmem:[%s4073_s26 + $0x5c] sm:$0x1] }
  0x1b   : > { %v471_v36 = vpack.c.bf16 %v367_v30, %v365_v29  ;;  %v371_v42 = vrot.slane %v246_v32, 1  ;;  %v249_v45 = vunpack.c.l.bf16 %v4124_v34  ;;  %v373_v46 = vrot.slane %v247_v38, 1 }
  0x1c   : > { %3385 = vmatprep.mubr.msk.bf16.mxu1 %vm488_vm2, %v470_v28  ;;  %v374_v47 = vrot.slane %v248_v39, 1  ;;  %v250_v48 = vunpack.c.l.bf16 %v4127_v35  ;;  %v370_v50 = vsel %vm357_vm1, %v368_v33, %v369_v41  ;;  %v251_v52 = vunpack.c.h.bf16 %v4127_v35 }
  0x1d   : > { %3521 = vmatprep.mubr.msk.bf16.mxu0 %vm488_vm2, %v471_v36  ;;  %3386 = vmatmul.mubr.msk.bf16.vlgmr.msra.gmra.mrb[0].mxu1 %vm488_vm2, %v471_v36  ;;  %v372_v51 = vsel %vm357_vm1, %v369_v41, %v371_v42  ;;  %v252_v53 = vunpack.c.l.bf16 %v4134_v40  ;;  %v376_v58 = vrot.slane %v249_v45, 1  ;;  %v253_v62 = vunpack.c.l.bf16 %v4155_v49 }
  0x1e   : > { %3418 = vmatpush3.bf16.msra.mxu1 %v751_v37  ;;  %v4167_v56 = vpack.c.bf16 %v372_v51, %v370_v50  ;;  %v375_v57 = vsel %vm357_vm1, %v373_v46, %v374_v47  ;;  %v378_v59 = vrot.slane %v250_v48, 1  ;;  %v379_v60 = vrot.slane %v251_v52, 1  ;;  %v4235_v51 = vld [vmem:[%s4073_s26 + $0x60] sm:$0xff]  }
  0x1f   : > { %3949 = vmatprep.subr.msk.bf16.mxu1 %vm537_vm0, %v4144_v44  ;;  %v381_v61 = vrot.slane %v252_v53, 1  ;;  %v254_v63 = vunpack.c.h.bf16 %v4155_v49  ;;  %v377_v4 = vsel %vm357_vm1, %v374_v47, %v376_v58  ;;  %v4964_v5 = vunpack.c.l.bf16 %v4162_v54  ;;  %v4242_v58 = vld [vmem:[%s4073_s26 + $0x68] sm:$0x1] }
  0x20   : > { %3522 = vmatmul.mubr.msk.bf16.vlgmr.msra.gmra.mrb[0].mxu0 %vm488_vm2, %v4167_v56  ;;  %3389 = vmatprep.mubr.msk.bf16.mxu1 %vm488_vm2, %v4167_v56  ;;  %v4963_v17 = vunpack.c.l.bf16 %v4165_v55  ;;  %v4958_v18 = vunpack.c.h.bf16 %v4165_v55  ;;  %v4201_v21 = vpack.c.bf16 %v377_v4, %v375_v57  ;;  %v380_v22 = vsel %vm357_vm1, %v378_v59, %v379_v60 }
  0x21   : > { %3554 = vmatpush3.bf16.msra.mxu0 %v1717_v43  ;;  %v382_v24 = vsel %vm357_vm1, %v379_v60, %v381_v61  ;;  %v383_v25 = vrot.slane %v253_v62, 1  ;;  %v384_v29 = vrot.slane %v254_v63, 1  ;;  %v386_v30 = vrot.slane %v4964_v5, 1 }
  0x22   : > { %v4210_v28 = vpack.c.bf16 %v382_v24, %v380_v22  ;;  %v4955_v33 = vunpack.c.l.bf16 %v4183_v0  ;;  %3954 = vmatprep.subr.msk.bf16.mxu0 %vm537_vm0, %v4188_v2  ;;  %3525 = vmatprep.mubr.msk.bf16.mxu0 %vm488_vm2, %v4201_v21  ;;  %v388_v36 = vrot.slane %v4963_v17, 1  ;;  %v389_v37 = vrot.slane %v4958_v18, 1 }
  0x23   : > { %v4954_v41 = vunpack.c.l.bf16 %v4199_v19  ;;  %v4953_v42 = vunpack.c.h.bf16 %v4199_v19  ;;  %v385_v43 = vsel %vm357_vm1, %v383_v25, %v384_v29  ;;  %v387_v46 = vsel %vm357_vm1, %v384_v29, %v386_v30  ;;  %v4260_v30 = vld [vmem:[%s4073_s26 + $0x6c] sm:$0xff]  }
  0x24   : > { %v391_v47 = vrot.slane %v4955_v33, 1  ;;  %v4949_v50 = vunpack.c.l.bf16 %v4208_v26  ;;  %v4239_v57 = vpack.c.bf16 %v387_v46, %v385_v43  ;;  %v4952_v4 = vunpack.c.l.bf16 %v4235_v51 }
  0x25   : > { %3390 = vmatmul.mubr.msk.bf16.gmra.mrb[4].mxu1 %vm488_vm2, %v4201_v21  ;;  %v393_v59 = vrot.slane %v4954_v41, 1  ;;  %v394_v60 = vrot.slane %v4953_v42, 1  ;;  %v390_v22 = vsel %vm357_vm1, %v388_v36, %v389_v37  ;;  %v4951_v25 = vunpack.c.h.bf16 %v4235_v51  ;;  %v4267_v36 = vld [vmem:[%s4073_s26 + $0x74] sm:$0x1] }
  0x26   : > { %3393 = vmatprep.mubr.msk.bf16.mxu1 %vm488_vm2, %v4210_v28  ;;  %v396_v61 = vrot.slane %v4949_v50, 1  ;;  %v392_v24 = vsel %vm357_vm1, %v389_v37, %v391_v47  ;;  %v4950_v29 = vunpack.c.l.bf16 %v4242_v58  ;;  %v920_v43 = vrot.slane %v241_v13, 2  ;;  %v4278_v50 = vld [vmem:[%s4073_s26 + $0x78] sm:$0xff]   ;;  %v4281_v13 = vld [vmem:[%s4073_s26 + $0x80] sm:$0x1] }
  0x27   : > { %v395_v46 = vsel %vm357_vm1, %v393_v59, %v394_v60  ;;  %v921_v37 = vrot.slane %v242_v15, 2  ;;  %v923_v47 = vrot.slane %v243_v16, 2  ;;  %v4273_v10 = vpack.c.bf16 %v392_v24, %v390_v22 }
  0x28   : > { %3526 = vmatmul.mubr.msk.bf16.gmra.mrb[4].mxu0 %vm488_vm2, %v4210_v28  ;;  %v397_v11 = vsel %vm357_vm1, %v394_v60, %v396_v61  ;;  %v398_v9 = vrot.slane %v4952_v4, 1  ;;  %v399_v59 = vrot.slane %v4951_v25, 1  ;;  %v401_v15 = vrot.slane %v4950_v29, 1 }
  0x29   : > { %3529 = vmatprep.mubr.msk.bf16.mxu0 %vm488_vm2, %v4239_v57  ;;  %v4957_v12 = vunpack.c.l.bf16 %v4260_v30  ;;  %v4956_v16 = vunpack.c.h.bf16 %v4260_v30  ;;  %v4293_v60 = vpack.c.bf16 %v397_v11, %v395_v46  ;;  %v4962_v61 = vunpack.c.l.bf16 %v4267_v36 }
  0x2a   : > { %v925_v22 = vrot.slane %v244_v20, 2  ;;  %v4960_v24 = vunpack.c.l.bf16 %v4278_v50  ;;  %v4959_v29 = vunpack.c.h.bf16 %v4278_v50  ;;  %v4961_v25 = vunpack.c.l.bf16 %v4281_v13 }
  0x2b   : > { %v926_v4 = vrot.slane %v245_v31, 2  ;;  %v928_v42 = vrot.slane %v246_v32, 2  ;;  %v922_v11 = vsel %vm914_vm3, %v920_v43, %v921_v37  ;;  %v924_v46 = vsel %vm914_vm3, %v921_v37, %v923_v47  ;;  %v4316_v31 = vld [vmem:[%s4073_s26 + $0x84] sm:$0xff]   ;;  %v4319_v32 = vld [vmem:[%s4073_s26 + $0x8c] sm:$0x1] }
  0x2c   : > { %v400_v20 = vsel %vm357_vm1, %v398_v9, %v399_v59  ;;  %v402_v41 = vsel %vm357_vm1, %v399_v59, %v401_v15  ;;  %v403_v33 = vrot.slane %v4957_v12, 1  ;;  %v404_v23 = vrot.slane %v4956_v16, 1  ;;  %v4334_v15 = vld [vmem:[%s4073_s26 + $0x90] sm:$0xff]  }
  0x2d   : > { %3394 = vmatmul.mubr.msk.bf16.gmra.mrb[8].mxu1 %vm488_vm2, %v4239_v57  ;;  %v406_v43 = vrot.slane %v4962_v61, 1  ;;  %v4325_v9 = vpack.c.bf16 %v924_v46, %v922_v11  ;;  %v408_v37 = vrot.slane %v4960_v24, 1  ;;  %v409_v47 = vrot.slane %v4959_v29, 1  ;;  %v4342_v46 = vld [vmem:[%s4073_s26 + $0x98] sm:$0x1] }
  0x2e   : > { %3397 = vmatprep.mubr.msk.bf16.mxu1 %vm488_vm2, %v4273_v10  ;;  %v411_v59 = vrot.slane %v4961_v25, 1  ;;  %v4336_v16 = vpack.c.bf16 %v402_v41, %v400_v20  ;;  %v4970_v12 = vunpack.c.l.bf16 %v4316_v31  ;;  %v4969_v18 = vunpack.c.h.bf16 %v4316_v31 }
  0x2f   : > { %v4965_v11 = vunpack.c.l.bf16 %v4319_v32  ;;  %v405_v29 = vsel %vm357_vm1, %v403_v33, %v404_v23  ;;  %v927_v24 = vsel %vm914_vm3, %v925_v22, %v926_v4  ;;  %v929_v25 = vsel %vm914_vm3, %v926_v4, %v928_v42 }
  0x30   : > { %3530 = vmatmul.mubr.msk.bf16.gmra.mrb[8].mxu0 %vm488_vm2, %v4273_v10  ;;  %v930_v41 = vrot.slane %v247_v38, 2  ;;  %v407_v20 = vsel %vm357_vm1, %v404_v23, %v406_v43  ;;  %v931_v61 = vrot.slane %v248_v39, 2  ;;  %v4968_v17 = vunpack.c.l.bf16 %v4334_v15 }
  0x31   : > { %3533 = vmatprep.mubr.msk.bf16.mxu0 %vm488_vm2, %v4293_v60  ;;  %v4966_v5 = vunpack.c.h.bf16 %v4334_v15  ;;  %v410_v33 = vsel %vm357_vm1, %v408_v37, %v409_v47  ;;  %v412_v42 = vsel %vm357_vm1, %v409_v47, %v411_v59  ;;  %v933_v38 = vrot.slane %v249_v45, 2 }
  0x32   : > { %v4967_v4 = vunpack.c.l.bf16 %v4342_v46  ;;  %v413_v22 = vrot.slane %v4970_v12, 1  ;;  %v414_v39 = vrot.slane %v4969_v18, 1  ;;  %v416_v23 = vrot.slane %v4965_v11, 1  ;;  %v4385_v11 = vld [vmem:[%s4073_s26 + $0x9c] sm:$0xff]  }
  0x33   : > { %v4371_v43 = vpack.c.bf16 %v407_v20, %v405_v29  ;;  %v4373_v37 = vpack.c.bf16 %v929_v25, %v927_v24  ;;  %v4377_v34 = vpack.c.bf16 %v412_v42, %v410_v33  ;;  %v932_v45 = vsel %vm914_vm3, %v930_v41, %v931_v61  ;;  %v4395_v41 = vld [vmem:[%s4073_s26 + $0xa4] sm:$0x1] }
  0x34   : > { %v418_v47 = vrot.slane %v4968_v17, 1  ;;  %v419_v59 = vrot.slane %v4966_v5, 1  ;;  %v934_v25 = vsel %vm914_vm3, %v931_v61, %v933_v38  ;;  %v935_v29 = vrot.slane %v250_v48, 2  ;;  %v4404_v38 = vld [vmem:[%s4073_s26 + $0xa8] sm:$0xff]   ;;  %v4407_v48 = vld [vmem:[%s4073_s26 + $0xb0] sm:$0x1] }
  0x35   : > { %3398 = vmatmul.mubr.msk.bf16.gmra.mrb[12].mxu1 %vm488_vm2, %v4293_v60  ;;  %v936_v24 = vrot.slane %v251_v52, 2  ;;  %v421_v20 = vrot.slane %v4967_v4, 1  ;;  %v415_v33 = vsel %vm357_vm1, %v413_v22, %v414_v39  ;;  %v417_v42 = vsel %vm357_vm1, %v414_v39, %v416_v23 }
  0x36   : > { %3401 = vmatprep.mubr.msk.bf16.mxu1 %vm488_vm2, %v4336_v16  ;;  %v938_v5 = vrot.slane %v252_v53, 2  ;;  %v940_v61 = vrot.slane %v253_v62, 2  ;;  %v941_v52 = vrot.slane %v254_v63, 2  ;;  %v4985_v22 = vunpack.c.l.bf16 %v4162_v54 }
  0x37   : > { %v4976_v39 = vunpack.c.l.bf16 %v4385_v11  ;;  %v4975_v40 = vunpack.c.h.bf16 %v4385_v11  ;;  %v1919_v53 = vsel %vm537_vm0, %v4188_v2, 0  ;;  %v4421_v62 = vpack.c.bf16 %v934_v25, %v932_v45 }
  0x38   : > { %3534 = vmatmul.mubr.msk.bf16.gmra.mrb[12].mxu0 %vm488_vm2, %v4336_v16  ;;  %v943_v4 = vrot.slane %v4985_v22, 2  ;;  %v420_v23 = vsel %vm357_vm1, %v418_v47, %v419_v59  ;;  %v4973_v17 = vunpack.c.l.bf16 %v4395_v41  ;;  %v422_v63 = vsel %vm357_vm1, %v419_v59, %v421_v20  ;;  %v4436_v47 = vld [vmem:[%s4943_s1 + $0xe] sm:$0x3] }
  0x39   : > { %3555 = vmatprep.mubr.msk.bf16.mxu0 %vm488_vm2, %v4325_v9  ;;  %v4971_v54 = vunpack.c.l.bf16 %v4404_v38  ;;  %v4972_v22 = vunpack.c.h.bf16 %v4404_v38  ;;  %v4974_v18 = vunpack.c.l.bf16 %v4407_v48  ;;  %v4429_v12 = vpack.c.bf16 %v417_v42, %v415_v33 }
  0x3a   : > { %v937_v2 = vsel %vm914_vm3, %v935_v29, %v936_v24  ;;  %v939_v45 = vsel %vm914_vm3, %v936_v24, %v938_v5  ;;  %v942_v59 = vsel %vm914_vm3, %v940_v61, %v941_v52  ;;  %v944_v25 = vsel %vm914_vm3, %v941_v52, %v943_v4  ;;  %v4461_v52 = vld [vmem:[%s4073_s26 + $0xb4] sm:$0xff]  }
  0x3b   : > { %4986 = vst [vmem:[#allocation3_spill] sm:$0xff] %v4429_v12  ;;  %v423_v20 = vrot.slane %v4976_v39, 1  ;;  %v424_v29 = vrot.slane %v4975_v40, 1  ;;  %v4448_v5 = vpack.c.bf16 %v422_v63, %v420_v23  ;;  %v426_v24 = vrot.slane %v4973_v17, 1 }
  0x3c   : > { %v4452_v33 = vpack.c.bf16 %v939_v45, %v937_v2  ;;  %v428_v4 = vrot.slane %v4971_v54, 1  ;;  %v429_v42 = vrot.slane %v4972_v22, 1  ;;  %v431_v61 = vrot.slane %v4974_v18, 1 }
  0x3d   : > { %3402 = vmatmul.mubr.msk.bf16.gmra.mrb[16].mxu1 %vm488_vm2, %v4371_v43  ;;  %v4468_v23 = vpack.c.bf16 %v944_v25, %v942_v59  ;;  %v4987_v63 = vunpack.c.l.bf16 %v4165_v55  ;;  %v4988_v45 = vunpack.c.h.bf16 %v4165_v55  ;;  %v4989_v22 = vunpack.c.l.bf16 %v4183_v0 }
  0x3e   : > { %3405 = vmatprep.mubr.msk.bf16.mxu1 %vm488_vm2, %v4377_v34  ;;  %v425_v18 = vsel %vm357_vm1, %v423_v20, %v424_v29  ;;  %v4990_v40 = vunpack.c.l.bf16 %v4199_v19  ;;  %v4991_v59 = vunpack.c.h.bf16 %v4199_v19  ;;  %v4992_v3 = vunpack.c.l.bf16 %v4208_v26 }
  0x3f   : > { %v945_v2 = vrot.slane %v4987_v63, 2  ;;  %v946_v54 = vrot.slane %v4988_v45, 2  ;;  %v948_v17 = vrot.slane %v4989_v22, 2  ;;  %v427_v0 = vsel %vm357_vm1, %v424_v29, %v426_v24 }
  0x40   : > { %3556 = vmatmul.mubr.msk.bf16.vlgmr.msra.gmra.mrb[0].mxu0 %vm488_vm2, %v4373_v37  ;;  %v950_v39 = vrot.slane %v4990_v40, 2  ;;  %v951_v25 = vrot.slane %v4991_v59, 2  ;;  %v953_v63 = vrot.slane %v4992_v3, 2  ;;  %v4981_v22 = vunpack.c.l.bf16 %v4461_v52 }
  0x41   : > { %3588 = vmatpush3.bf16.msra.mxu0 %v1919_v53  ;;  %3559 = vmatprep.mubr.msk.bf16.mxu0 %vm488_vm2, %v4421_v62  ;;  %v4464_v53 = vld [vmem:[%s4073_s26 + $0xbc] sm:$0x1]  ;;  %v4980_v45 = vunpack.c.h.bf16 %v4461_v52  ;;  %v432_v40 = vsel %vm357_vm1, %v429_v42, %v431_v61  ;;  %v947_v59 = vsel %vm914_vm3, %v945_v2, %v946_v54  ;;  %v4496_v3 = vpack.c.bf16 %v427_v0, %v425_v18 }
  0x42   : > { %3955 = vmatprep.subr.msk.bf16.mxu0 %vm537_vm0, %v4436_v47  ;;  %v949_v26 = vsel %vm914_vm3, %v946_v54, %v948_v17  ;;  %v952_v29 = vsel %vm914_vm3, %v950_v39, %v951_v25  ;;  %v954_v24 = vsel %vm914_vm3, %v951_v25, %v953_v63  ;;  %v4994_v18 = vunpack.c.l.bf16 %v4464_v53 }
  0x43   : > { %v4513_v17 = vpack.c.bf16 %v949_v26, %v947_v59  ;;  %v4515_v39 = vpack.c.bf16 %v954_v24, %v952_v29  ;;  %v4995_v54 = vunpack.c.l.bf16 %v4235_v51  ;;  %v4996_v63 = vunpack.c.h.bf16 %v4235_v51 }
  0x44   : > { %v436_v61 = vrot.slane %v4994_v18, 1  ;;  %v4998_v59 = vunpack.c.l.bf16 %v4260_v30  ;;  %v4999_v29 = vunpack.c.h.bf16 %v4260_v30 }
  0x45   : > { %3406 = vmatmul.mubr.msk.bf16.gmra.mrb[20].mxu1 %vm488_vm2, %v4429_v12  ;;  %v430_v12 = vsel %vm357_vm1, %v428_v4, %v429_v42  ;;  %v433_v4 = vrot.slane %v4981_v22, 1  ;;  %v434_v42 = vrot.slane %v4980_v45, 1  ;;  %v956_v0 = vrot.slane %v4996_v63, 2 }
  0x46   : > { %3409 = vmatprep.mubr.msk.bf16.mxu1 %vm488_vm2, %v4448_v5  ;;  %v4503_v20 = vpack.c.bf16 %v432_v40, %v430_v12  ;;  %v955_v12 = vrot.slane %v4995_v54, 2  ;;  %v4997_v40 = vunpack.c.l.bf16 %v4242_v58  ;;  %v960_v26 = vrot.slane %v4998_v59, 2 }
  0x47   : > { %v435_v2 = vsel %vm357_vm1, %v433_v4, %v434_v42  ;;  %v437_v25 = vsel %vm357_vm1, %v434_v42, %v436_v61  ;;  %v961_v24 = vrot.slane %v4999_v29, 2  ;;  %v5000_v54 = vunpack.c.l.bf16 %v4267_v36 }
  0x48   : > { %3560 = vmatmul.mubr.msk.bf16.gmra.mrb[4].mxu0 %vm488_vm2, %v4452_v33  ;;  %4993 = vst [vmem:[#allocation4_spill] sm:$0xff] %v4503_v20  ;;  %v958_v18 = vrot.slane %v4997_v40, 2  ;;  %v5001_v22 = vunpack.c.l.bf16 %v4076_v6  ;;  %v5002_v42 = vunpack.c.h.bf16 %v4076_v6  ;;  %v5003_v63 = vunpack.c.l.bf16 %v4079_v7 }
  0x49   : > { %3563 = vmatprep.mubr.msk.bf16.mxu0 %vm488_vm2, %v4468_v23  ;;  %v963_v45 = vrot.slane %v5000_v54, 2  ;;  %v4541_v58 = vpack.c.bf16 %v437_v25, %v435_v2  ;;  %v957_v36 = vsel %vm914_vm3, %v955_v12, %v956_v0  ;;  %v5004_v2 = vunpack.c.l.bf16 %v4278_v50 }
  0x4a   : > { %v915_v4 = vrot.slane %v5001_v22, 2  ;;  %v916_v61 = vrot.slane %v5002_v42, 2  ;;  %v959_v40 = vsel %vm914_vm3, %v956_v0, %v958_v18  ;;  %v962_v22 = vsel %vm914_vm3, %v960_v26, %v961_v24 }
  0x4b   : > { %v964_v59 = vsel %vm914_vm3, %v961_v24, %v963_v45  ;;  %v4554_v7 = vpack.c.bf16 %v959_v40, %v957_v36  ;;  %v965_v25 = vrot.slane %v5004_v2, 2  ;;  %v5005_v45 = vunpack.c.h.bf16 %v4278_v50 }
  0x4c   : > { %v4550_v29 = vsel %vm914_vm3, %v915_v4, %v916_v61  ;;  %v4563_v12 = vpack.c.bf16 %v964_v59, %v962_v22  ;;  %v5006_v18 = vunpack.c.l.bf16 %v4281_v13  ;;  %v5007_v4 = vunpack.c.l.bf16 %v4316_v31 }
  0x4d   : > { %3410 = vmatmul.mubr.msk.bf16.gmra.mrb[24].mxu1 %vm488_vm2, %v4496_v3  ;;  %v966_v0 = vrot.slane %v5005_v45, 2  ;;  %v1094_v40 = vsel %vm537_vm0, %v4144_v44, 0  ;;  %v5010_v44 = vunpack.c.l.bf16 %v4334_v15 }
  0x4e   : > { %3413 = vmatprep.mubr.msk.bf16.mxu1 %vm488_vm2, %v4503_v20  ;;  %v918_v20 = vrot.slane %v5003_v63, 2  ;;  %v968_v26 = vrot.slane %v5006_v18, 2  ;;  %v970_v42 = vrot.slane %v5007_v4, 2  ;;  %v5009_v63 = vunpack.c.l.bf16 %v4319_v32  ;;  %v4590_v32 = vld [vmem:[%s4943_s1 + $0x6] sm:$0x3] }
  0x4f   : > { %v967_v13 = vsel %vm914_vm3, %v965_v25, %v966_v0  ;;  %v975_v45 = vrot.slane %v5010_v44, 2 }
  0x50   : > { %3564 = vmatmul.mubr.msk.bf16.gmra.mrb[8].mxu0 %vm488_vm2, %v4513_v17  ;;  %v4559_v54 = vsel %vm914_vm3, %v916_v61, %v918_v20  ;;  %v5008_v20 = vunpack.c.h.bf16 %v4316_v31  ;;  %v969_v36 = vsel %vm914_vm3, %v966_v0, %v968_v26  ;;  %v5011_v0 = vunpack.c.h.bf16 %v4334_v15 }
  0x51   : > { %3567 = vmatprep.mubr.msk.bf16.mxu0 %vm488_vm2, %v4515_v39  ;;  %v1027_v24 = vpack.c.bf16 %v4559_v54, %v4550_v29  ;;  %v4594_v2 = vpack.c.bf16 %v969_v36, %v967_v13  ;;  %v5012_v26 = vunpack.c.l.bf16 %v4342_v46  ;;  %v237_v54 = vld [vmem:[%s4073_s26 + $0xd4] sm:$0x1] }
  0x52   : > { %v971_v61 = vrot.slane %v5008_v20, 2  ;;  %v976_v18 = vrot.slane %v5011_v0, 2  ;;  %v5017_v0 = vunpack.c.h.bf16 %v4404_v38 }
  0x53   : > { %v978_v4 = vrot.slane %v5012_v26, 2 }
  0x54   : > { %v972_v22 = vsel %vm914_vm3, %v970_v42, %v971_v61  ;;  %v5013_v42 = vunpack.c.l.bf16 %v4385_v11  ;;  %v977_v46 = vsel %vm914_vm3, %v975_v45, %v976_v18  ;;  %v986_v26 = vrot.slane %v5017_v0, 2 }
  0x55   : > { %3414 = vmatmul.mubr.msk.bf16.gmra.mrb[28].mxu1 %vm488_vm2, %v4541_v58  ;;  %v979_v36 = vsel %vm914_vm3, %v976_v18, %v978_v4  ;;  %v5018_v18 = vunpack.c.l.bf16 %v4407_v48 }
  0x56   : > { %3419 = vmatprep.mubr.msk.bf16.mxu1 %vm488_vm2, %v4076_v6  ;;  %v973_v6 = vrot.slane %v5009_v63, 2  ;;  %v980_v20 = vrot.slane %v5013_v42, 2  ;;  %v5019_v42 = vunpack.c.l.bf16 %v4461_v52 }
  0x57   : > { %v988_v4 = vrot.slane %v5018_v18, 2 }
  0x58   : > { %3568 = vmatmul.mubr.msk.bf16.gmra.mrb[12].mxu0 %vm488_vm2, %v4554_v7  ;;  %v974_v59 = vsel %vm914_vm3, %v971_v61, %v973_v6  ;;  %v5014_v61 = vunpack.c.h.bf16 %v4385_v11  ;;  %v5015_v6 = vunpack.c.l.bf16 %v4395_v41 }
  0x59   : > { %3571 = vmatprep.mubr.msk.bf16.mxu0 %vm488_vm2, %v4563_v12  ;;  %v4598_v25 = vpack.c.bf16 %v974_v59, %v972_v22  ;;  %v4624_v22 = vpack.c.bf16 %v979_v36, %v977_v46  ;;  %v5016_v59 = vunpack.c.l.bf16 %v4404_v38  ;;  %v4643_v46 = vld [vmem:[%s4073_s26 + $0xc0] sm:$0xff]   ;;  %v234_v36 = vld [vmem:[%s4073_s26 + $0xc8] sm:$0x1]  ;;  %v989_v48 = vsel %vm914_vm3, %v986_v26, %v988_v4 }
  0x5a   : > { %v981_v63 = vrot.slane %v5014_v61, 2  ;;  %v983_v13 = vrot.slane %v5015_v6, 2  ;;  %v5020_v61 = vunpack.c.h.bf16 %v4461_v52  ;;  %v5021_v6 = vunpack.c.l.bf16 %v4464_v53 }
  0x5b   : > { %v985_v44 = vrot.slane %v5016_v59, 2  ;;  %v287_v59 = vunpack.c.h.bf16 %v4643_v46  ;;  %v288_v0 = vunpack.c.l.bf16 %v234_v36 }
  0x5c   : > { %v984_v41 = vsel %vm914_vm3, %v981_v63, %v983_v13  ;;  %v993_v13 = vrot.slane %v5021_v6, 2 }
  0x5d   : > { %3420 = vmatmul.mubr.msk.bf16.vlgmr.msra.gmra.mrb[0].mxu1 %vm488_vm2, %v4082_v8  ;;  %v1704_v4 = vrot.slane %v287_v59, 2  ;;  %v1497_v36 = vrot.slane %v288_v0, 1 }
  0x5e   : > { %3452 = vmatpush3.bf16.msra.mxu1 %v1094_v40  ;;  %3423 = vmatprep.mubr.msk.bf16.mxu1 %vm488_vm2, %v4092_v14  ;;  %v982_v40 = vsel %vm914_vm3, %v980_v20, %v981_v63  ;;  %v990_v20 = vrot.slane %v5019_v42, 2  ;;  %v991_v63 = vrot.slane %v5020_v61, 2  ;;  %v1706_v61 = vrot.slane %v288_v0, 2 }
  0x5f   : > { %3950 = vmatprep.subr.msk.bf16.mxu1 %vm537_vm0, %v4590_v32  ;;  %v4632_v45 = vpack.c.bf16 %v984_v41, %v982_v40  ;;  %v987_v40 = vsel %vm914_vm3, %v985_v44, %v986_v26  ;;  %v286_v41 = vunpack.c.l.bf16 %v4643_v46  ;;  %v291_v0 = vunpack.c.l.bf16 %v237_v54 }
  0x60   : > { %3572 = vmatmul.mubr.msk.bf16.gmra.mrb[16].mxu0 %vm488_vm2, %v4594_v2  ;;  %v992_v53 = vsel %vm914_vm3, %v990_v20, %v991_v63  ;;  %v994_v18 = vsel %vm914_vm3, %v991_v63, %v993_v13  ;;  %v4658_v42 = vpack.c.bf16 %v989_v48, %v987_v40  ;;  %v1495_v20 = vrot.slane %v287_v59, 1  ;;  %v3052_v59 = vld [vmem:[%s4943_s1 + $0x10] sm:$0x3] }
  0x61   : > { %3575 = vmatprep.mubr.msk.bf16.mxu0 %vm488_vm2, %v4598_v25  ;;  %v4662_v44 = vpack.c.bf16 %v994_v18, %v992_v53  ;;  %v1703_v26 = vrot.slane %v286_v41, 2  ;;  %v1494_v6 = vrot.slane %v286_v41, 1  ;;  %v1707_v13 = vsel %vm914_vm3, %v1704_v4, %v1706_v61 }
  0x62   : > { %v1498_v48 = vsel %vm357_vm1, %v1495_v20, %v1497_v36  ;;  %v2131_v41 = vsel %vm537_vm0, %v4436_v47, 0  ;;  %v1296_v47 = vsel %vm537_vm0, %v4590_v32, 0 }
  0x63   : > { %v1705_v63 = vsel %vm914_vm3, %v1703_v26, %v1704_v4  ;;  %v1496_v40 = vsel %vm357_vm1, %v1494_v6, %v1495_v20  ;;  %v2329_v26 = vrot.slane %v291_v0, 2  ;;  %v2340_v20 = vsel %vm537_vm0, %v3052_v59, 0 }
  0x64   : > { %v4672_v53 = vpack.c.bf16 %v1498_v48, %v1496_v40  ;;  %v4676_v18 = vpack.c.bf16 %v1707_v13, %v1705_v63 }
  0x65   : > { %3424 = vmatmul.mubr.msk.bf16.gmra.mrb[4].mxu1 %vm488_vm2, %v4115_v27 }
  0x66   : > { %3427 = vmatprep.mubr.msk.bf16.mxu1 %vm488_vm2, %v4127_v35 }
  0x68   : > { %3576 = vmatmul.mubr.msk.bf16.gmra.mrb[20].mxu0 %vm488_vm2, %v4624_v22 }
  0x69   : > { %3579 = vmatprep.mubr.msk.bf16.mxu0 %vm488_vm2, %v4632_v45 }
  0x6d   : > { %3428 = vmatmul.mubr.msk.bf16.gmra.mrb[8].mxu1 %vm488_vm2, %v4155_v49 }
  0x6e   : > { %3431 = vmatprep.mubr.msk.bf16.mxu1 %vm488_vm2, %v4165_v55 }
  0x70   : > { %3580 = vmatmul.mubr.msk.bf16.gmra.mrb[24].mxu0 %vm488_vm2, %v4658_v42 }
  0x71   : > { %3583 = vmatprep.mubr.msk.bf16.mxu0 %vm488_vm2, %v4662_v44 }
  0x75   : > { %3432 = vmatmul.mubr.msk.bf16.gmra.mrb[12].mxu1 %vm488_vm2, %v4199_v19 }
  0x76   : > { %3435 = vmatprep.mubr.msk.bf16.mxu1 %vm488_vm2, %v4235_v51 }
  0x78   : > { %3584 = vmatmul.mubr.msk.bf16.gmra.mrb[28].mxu0 %vm488_vm2, %v4676_v18 }
  0x79   : > { %3589 = vmatprep.mubr.msk.bf16.mxu0 %vm488_vm2, %v4092_v14 }
  0x7d   : > { %3436 = vmatmul.mubr.msk.bf16.gmra.mrb[16].mxu1 %vm488_vm2, %v4260_v30 }
  0x7e   : > { %3439 = vmatprep.mubr.msk.bf16.mxu1 %vm488_vm2, %v4278_v50 }
  0x80   : > { %3590 = vmatmul.mubr.msk.bf16.vlgmr.msra.gmra.mrb[0].mxu0 %vm488_vm2, %v4115_v27 }
  0x81   : > { %3622 = vmatpush3.bf16.msra.mxu0 %v2131_v41  ;;  %3593 = vmatprep.mubr.msk.bf16.mxu0 %vm488_vm2, %v4127_v35 }
  0x82   : > { %3956 = vmatprep.subr.msk.bf16.mxu0 %vm537_vm0, %v3052_v59 }
  0x85   : > { %3440 = vmatmul.mubr.msk.bf16.gmra.mrb[20].mxu1 %vm488_vm2, %v4316_v31 }
  0x86   : > { %3443 = vmatprep.mubr.msk.bf16.mxu1 %vm488_vm2, %v4334_v15 }
  0x88   : > { %3594 = vmatmul.mubr.msk.bf16.gmra.mrb[4].mxu0 %vm488_vm2, %v4155_v49 }
  0x89   : > { %3597 = vmatprep.mubr.msk.bf16.mxu0 %vm488_vm2, %v4165_v55 }
  0x8d   : > { %3444 = vmatmul.mubr.msk.bf16.gmra.mrb[24].mxu1 %vm488_vm2, %v4385_v11 }
  0x8e   : > { %3447 = vmatprep.mubr.msk.bf16.mxu1 %vm488_vm2, %v4404_v38 }
  0x90   : > { %3598 = vmatmul.mubr.msk.bf16.gmra.mrb[8].mxu0 %vm488_vm2, %v4199_v19 }
  0x91   : > { %3601 = vmatprep.mubr.msk.bf16.mxu0 %vm488_vm2, %v4235_v51 }
  0x95   : > { %3448 = vmatmul.mubr.msk.bf16.gmra.mrb[28].mxu1 %vm488_vm2, %v4461_v52 }
  0x96   : > { %3453 = vmatprep.mubr.msk.bf16.mxu1 %vm488_vm2, %v1027_v24 }
  0x98   : > { %3602 = vmatmul.mubr.msk.bf16.gmra.mrb[12].mxu0 %vm488_vm2, %v4260_v30 }
  0x99   : > { %3605 = vmatprep.mubr.msk.bf16.mxu0 %vm488_vm2, %v4278_v50 }
  0x9d   : > { %3454 = vmatmul.mubr.msk.bf16.vlgmr.msra.gmra.mrb[0].mxu1 %vm488_vm2, %v4325_v9 }
  0x9e   : > { %3486 = vmatpush3.bf16.msra.mxu1 %v1296_v47  ;;  %3457 = vmatprep.mubr.msk.bf16.mxu1 %vm488_vm2, %v4373_v37 }
  0x9f   : > { %3952 = vmatprep.subr.msk.bf16.mxu1 %vm537_vm0, %v4046_v1  ;;  %v235_v1 = vld [vmem:[%s4073_s26 + $0xcc] sm:$0xff]  }
  0xa0   : > { %3606 = vmatmul.mubr.msk.bf16.gmra.mrb[16].mxu0 %vm488_vm2, %v4316_v31  ;;  %v289_v9 = vunpack.c.l.bf16 %v235_v1  ;;  %v290_v29 = vunpack.c.h.bf16 %v235_v1 }
  0xa1   : > { %3609 = vmatprep.mubr.msk.bf16.mxu0 %vm488_vm2, %v4334_v15 }
  0xa2   : > { %v2326_v24 = vrot.slane %v289_v9, 2  ;;  %v2327_v32 = vrot.slane %v290_v29, 2 }
  0xa4   : > { %v4757_v4 = vsel %vm914_vm3, %v2326_v24, %v2327_v32  ;;  %v4762_v61 = vsel %vm914_vm3, %v2327_v32, %v2329_v26 }
  0xa5   : > { %3458 = vmatmul.mubr.msk.bf16.gmra.mrb[4].mxu1 %vm488_vm2, %v4421_v62  ;;  %v2333_v6 = vpack.c.bf16 %v4762_v61, %v4757_v4 }
  0xa6   : > { %3461 = vmatprep.mubr.msk.bf16.mxu1 %vm488_vm2, %v4452_v33 }
  0xa8   : > { %3610 = vmatmul.mubr.msk.bf16.gmra.mrb[20].mxu0 %vm488_vm2, %v4385_v11 }
  0xa9   : > { %3613 = vmatprep.mubr.msk.bf16.mxu0 %vm488_vm2, %v4404_v38 }
  0xad   : > { %3462 = vmatmul.mubr.msk.bf16.gmra.mrb[8].mxu1 %vm488_vm2, %v4468_v23 }
  0xae   : > { %3465 = vmatprep.mubr.msk.bf16.mxu1 %vm488_vm2, %v4513_v17 }
  0xb0   : > { %3614 = vmatmul.mubr.msk.bf16.gmra.mrb[24].mxu0 %vm488_vm2, %v4461_v52 }
  0xb1   : > { %3617 = vmatprep.mubr.msk.bf16.mxu0 %vm488_vm2, %v4643_v46 }
  0xb5   : > { %3466 = vmatmul.mubr.msk.bf16.gmra.mrb[12].mxu1 %vm488_vm2, %v4515_v39 }
  0xb6   : > { %3469 = vmatprep.mubr.msk.bf16.mxu1 %vm488_vm2, %v4554_v7 }
  0xb8   : > { %3618 = vmatmul.mubr.msk.bf16.gmra.mrb[28].mxu0 %vm488_vm2, %v235_v1 }
  0xb9   : > { %3623 = vmatprep.mubr.msk.bf16.mxu0 %vm488_vm2, %v4167_v56  ;;  %v5023_v56 = vld [vmem:[#allocation3_spill] sm:$0xff] }
  0xbd   : > { %3470 = vmatmul.mubr.msk.bf16.gmra.mrb[16].mxu1 %vm488_vm2, %v4563_v12 }
  0xbe   : > { %3473 = vmatprep.mubr.msk.bf16.mxu1 %vm488_vm2, %v4594_v2 }
  0xc0   : > { %3624 = vmatmul.mubr.msk.bf16.vlgmr.msra.gmra.mrb[0].mxu0 %vm488_vm2, %v4201_v21  ;;  %v2120_v21 = vrot.slane %v291_v0, 1 }
  0xc1   : > { %3656 = vmatpush3.bf16.msra.mxu0 %v2340_v20  ;;  %3627 = vmatprep.mubr.msk.bf16.mxu0 %vm488_vm2, %v4210_v28 }
  0xc5   : > { %3474 = vmatmul.mubr.msk.bf16.gmra.mrb[20].mxu1 %vm488_vm2, %v4598_v25 }
  0xc6   : > { %3477 = vmatprep.mubr.msk.bf16.mxu1 %vm488_vm2, %v4624_v22 }
  0xc8   : > { %3628 = vmatmul.mubr.msk.bf16.gmra.mrb[4].mxu0 %vm488_vm2, %v4239_v57 }
  0xc9   : > { %3631 = vmatprep.mubr.msk.bf16.mxu0 %vm488_vm2, %v4273_v10  ;;  %v5022_v10 = vld [vmem:[#allocation2_spill] sm:$0xff] }
  0xcd   : > { %3478 = vmatmul.mubr.msk.bf16.gmra.mrb[24].mxu1 %vm488_vm2, %v4632_v45 }
  0xce   : > { %3481 = vmatprep.mubr.msk.bf16.mxu1 %vm488_vm2, %v4658_v42 }
  0xd0   : > { %3632 = vmatmul.mubr.msk.bf16.gmra.mrb[8].mxu0 %vm488_vm2, %v4293_v60 }
  0xd1   : > { %3635 = vmatprep.mubr.msk.bf16.mxu0 %vm488_vm2, %v4336_v16 }
  0xd5   : > { %3482 = vmatmul.mubr.msk.bf16.gmra.mrb[28].mxu1 %vm488_vm2, %v4662_v44 }
  0xd6   : > { %3487 = vmatprep.mubr.msk.bf16.mxu1 %vm488_vm2, %v4082_v8  ;;  %v5024_v8 = vld [vmem:[#allocation4_spill] sm:$0xff] }
  0xd8   : > { %3636 = vmatmul.mubr.msk.bf16.gmra.mrb[12].mxu0 %vm488_vm2, %v4371_v43 }
  0xd9   : > { %3639 = vmatprep.mubr.msk.bf16.mxu0 %vm488_vm2, %v4377_v34 }
  0xdd   : > { %3488 = vmatmul.mubr.msk.bf16.vlgmr.msra.gmra.mrb[0].mxu1 %vm488_vm2, %v4092_v14  ;;  %v2117_v14 = vrot.slane %v289_v9, 1 }
  0xde   : > { %3690 = vmatpush3.bf16.msra.mxu1 %v5022_v10  ;;  %3491 = vmatprep.mubr.msk.bf16.mxu1 %vm488_vm2, %v4115_v27  ;;  %v2118_v27 = vrot.slane %v290_v29, 1 }
  0xe0   : > { %3640 = vmatmul.mubr.msk.bf16.gmra.mrb[16].mxu0 %vm488_vm2, %v5023_v56 }
  0xe1   : > { %3643 = vmatprep.mubr.msk.bf16.mxu0 %vm488_vm2, %v4448_v5 }
  0xe5   : > { %3492 = vmatmul.mubr.msk.bf16.gmra.mrb[4].mxu1 %vm488_vm2, %v4127_v35  ;;  %v2119_v35 = vsel %vm357_vm1, %v2117_v14, %v2118_v27 }
  0xe6   : > { %3495 = vmatprep.mubr.msk.bf16.mxu1 %vm488_vm2, %v4155_v49  ;;  %v2121_v49 = vsel %vm357_vm1, %v2118_v27, %v2120_v21 }
  0xe8   : > { %3644 = vmatmul.mubr.msk.bf16.gmra.mrb[20].mxu0 %vm488_vm2, %v4496_v3 }
  0xe9   : > { %3647 = vmatprep.mubr.msk.bf16.mxu0 %vm488_vm2, %v5024_v8 }
  0xed   : > { %3496 = vmatmul.mubr.msk.bf16.gmra.mrb[8].mxu1 %vm488_vm2, %v4165_v55  ;;  %v2124_v55 = vpack.c.bf16 %v2121_v49, %v2119_v35 }
  0xee   : > { %3499 = vmatprep.mubr.msk.bf16.mxu1 %vm488_vm2, %v4199_v19 }
  0xf0   : > { %3648 = vmatmul.mubr.msk.bf16.gmra.mrb[24].mxu0 %vm488_vm2, %v4541_v58 }
  0xf1   : > { %3651 = vmatprep.mubr.msk.bf16.mxu0 %vm488_vm2, %v4672_v53 }
  0xf5   : > { %3500 = vmatmul.mubr.msk.bf16.gmra.mrb[12].mxu1 %vm488_vm2, %v4235_v51 }
  0xf6   : > { %3503 = vmatprep.mubr.msk.bf16.mxu1 %vm488_vm2, %v4260_v30 }
  0xf8   : > { %3652 = vmatmul.mubr.msk.bf16.gmra.mrb[28].mxu0 %vm488_vm2, %v2124_v55 }
  0xf9   : > { %3657 = vmatprep.mubr.msk.bf16.mxu0 %vm488_vm2, %v4373_v37 }
  0xfd   : > { %3504 = vmatmul.mubr.msk.bf16.gmra.mrb[16].mxu1 %vm488_vm2, %v4278_v50 }
  0xfe   : > { %3507 = vmatprep.mubr.msk.bf16.mxu1 %vm488_vm2, %v4316_v31 }
 0x100   : > { %3658 = vmatmul.mubr.msk.bf16.vlgmr.msra.gmra.mrb[0].mxu0 %vm488_vm2, %v4421_v62 }
 0x101   : > { %3661 = vmatprep.mubr.msk.bf16.mxu0 %vm488_vm2, %v4452_v33 }
 0x105   : > { %3508 = vmatmul.mubr.msk.bf16.gmra.mrb[20].mxu1 %vm488_vm2, %v4334_v15 }
 0x106   : > { %3511 = vmatprep.mubr.msk.bf16.mxu1 %vm488_vm2, %v4385_v11 }
 0x108   : > { %3662 = vmatmul.mubr.msk.bf16.gmra.mrb[4].mxu0 %vm488_vm2, %v4468_v23 }
 0x109   : > { %3665 = vmatprep.mubr.msk.bf16.mxu0 %vm488_vm2, %v4513_v17 }
 0x10d   : > { %3512 = vmatmul.mubr.msk.bf16.gmra.mrb[24].mxu1 %vm488_vm2, %v4404_v38 }
 0x10e   : > { %3515 = vmatprep.mubr.msk.bf16.mxu1 %vm488_vm2, %v4461_v52 }
 0x110   : > { %3666 = vmatmul.mubr.msk.bf16.gmra.mrb[8].mxu0 %vm488_vm2, %v4515_v39 }
 0x111   : > { %3669 = vmatprep.mubr.msk.bf16.mxu0 %vm488_vm2, %v4554_v7 }
 0x115   : > { %3516 = vmatmul.mubr.msk.bf16.gmra.mrb[28].mxu1 %vm488_vm2, %v4643_v46 }
 0x116   : > { %3537 = vmatprep.mubr.msk.bf16.mxu1 %vm488_vm2, %v4371_v43 }
 0x118   : > { %3670 = vmatmul.mubr.msk.bf16.gmra.mrb[12].mxu0 %vm488_vm2, %v4563_v12 }
 0x119   : > { %3673 = vmatprep.mubr.msk.bf16.mxu0 %vm488_vm2, %v4594_v2 }
 0x11d   : > { %3538 = vmatmul.mubr.msk.bf16.vlgmr.msra.gmra.mrb[16].mxu1 %vm488_vm2, %v4377_v34 }
 0x11e   : > { %3541 = vmatprep.mubr.msk.bf16.mxu1 %vm488_vm2, %v5023_v56 }
 0x120   : > { %3674 = vmatmul.mubr.msk.bf16.gmra.mrb[16].mxu0 %vm488_vm2, %v4598_v25 }
 0x121   : > { %3677 = vmatprep.mubr.msk.bf16.mxu0 %vm488_vm2, %v4624_v22 }
 0x125   : > { %3542 = vmatmul.mubr.msk.bf16.gmra.mrb[20].mxu1 %vm488_vm2, %v4448_v5 }
 0x126   : > { %3545 = vmatprep.mubr.msk.bf16.mxu1 %vm488_vm2, %v4496_v3 }
 0x128   : > { %3678 = vmatmul.mubr.msk.bf16.gmra.mrb[20].mxu0 %vm488_vm2, %v4632_v45 }
 0x129   : > { %3681 = vmatprep.mubr.msk.bf16.mxu0 %vm488_vm2, %v4658_v42 }
 0x12d   : > { %3546 = vmatmul.mubr.msk.bf16.gmra.mrb[24].mxu1 %vm488_vm2, %v5024_v8 }
 0x12e   : > { %3549 = vmatprep.mubr.msk.bf16.mxu1 %vm488_vm2, %v4541_v58 }
 0x130   : > { %3682 = vmatmul.mubr.msk.bf16.gmra.mrb[24].mxu0 %vm488_vm2, %v4662_v44 }
 0x131   : > { %3685 = vmatprep.mubr.msk.bf16.mxu0 %vm488_vm2, %v4676_v18 }
 0x135   : > { %3550 = vmatmul.mubr.msk.bf16.gmra.mrb[28].mxu1 %vm488_vm2, %v4672_v53 }
 0x138   : > { %3686 = vmatmul.mubr.msk.bf16.gmra.mrb[28].mxu0 %vm488_vm2, %v2333_v6 }
 0x1b0   : > { %v3489_v19 = vpop.f32.mrb[0].mxu1 }
 0x1b1   : > { %v1332_v28 = vpop.f32.mrb[1].mxu1 }
 0x1b2   : > { %v3490_v50 = vpop.f32.mrb[2].mxu1 }
 0x1b3   : > { %v1335_v51 = vpop.f32.mrb[3].mxu1 }
 0x1b8   : > { %v3493_v57 = vpop.f32.mrb[4].mxu1 }
 0x1b9   : > { %v1348_v30 = vpop.f32.mrb[5].mxu1 }
 0x1ba   : > { %v3494_v16 = vpop.f32.mrb[6].mxu1 }
 0x1bb   : > { %v1351_v60 = vpop.f32.mrb[7].mxu1 }
 0x1c0   : > { %v3497_v31 = vpop.f32.mrb[8].mxu1 }
 0x1c1   : > { %v1364_v15 = vpop.f32.mrb[9].mxu1 }
 0x1c2   : > { %v3498_v11 = vpop.f32.mrb[10].mxu1 }
 0x1c3   : > { %v4898_v43 = vpop.f32.mrb[11].mxu1 }
 0x1c8   : > { %v4900_v37 = vpop.f32.mrb[12].mxu1 }
 0x1c9   : > { %v4902_v34 = vpop.f32.mrb[13].mxu1 }
 0x1ca   : > { %v4904_v38 = vpop.f32.mrb[14].mxu1 }
 0x1cb   : > { %v4907_v62 = vpop.f32.mrb[15].mxu1 }
 0x1d3   : > { %v3659_v5 = vpop.f32.mrb[0].mxu0 }
 0x1d4   : > { %v3691_v33 = vadd.f32 %v3659_v5, %v3489_v19  ;;  %v2376_v52 = vpop.f32.mrb[1].mxu0 }
 0x1d5   : > { %v3692_v23 = vadd.f32 %v2376_v52, %v1332_v28  ;;  %v3660_v3 = vpop.f32.mrb[2].mxu0 }
 0x1d6   : > { %v3693_v17 = vadd.f32 %v3660_v3, %v3490_v50  ;;  %v2379_v39 = vpop.f32.mrb[3].mxu0  ;;  %v2735_v45 = vmul.f32 %v3691_v33, %v3691_v33 }
 0x1d7   : > { %v3694_v58 = vadd.f32 %v2379_v39, %v1335_v51  ;;  %v2733_v12 = vmul.f32 %v3692_v23, %v3692_v23 }
 0x1d8   : > { %v3143_v7 = vpack.c.bf16 %v3693_v17, %v3691_v33  ;;  %v2736_v13 = vmul.f32 %v3693_v17, %v3693_v17 }
 0x1d9   : > { %v3138_v2 = vpack.c.bf16 %v3694_v58, %v3692_v23  ;;  %v2695_v25 = vadd.f32 %v3694_v58, %v3692_v23  ;;  %v2734_v22 = vmul.f32 %v3694_v58, %v3694_v58 }
 0x1da   : > { %3215 = vst [vmem:[%s4912_s16 + $0x8] sm:$0xff] %v3143_v7  }
 0x1db   : > { %3139 = vst [vmem:[%s4912_s16] sm:$0xff] %v3138_v2   ;;  %v2696_v46 = vadd.f32 %v3691_v33, %v2695_v25  ;;  %v2765_v42 = vadd.f32 %v2734_v22, %v2733_v12  ;;  %v3663_v44 = vpop.f32.mrb[4].mxu0 }
 0x1dc   : > { %v3695_v36 = vadd.f32 %v3663_v44, %v3493_v57  ;;  %v2392_v63 = vpop.f32.mrb[5].mxu0 }
 0x1dd   : > { %v2766_v40 = vadd.f32 %v2765_v42, %v2735_v45  ;;  %v3696_v48 = vadd.f32 %v2392_v63, %v1348_v30  ;;  %v2697_v53 = vadd.f32 %v3693_v17, %v2696_v46  ;;  %v3664_v18 = vpop.f32.mrb[6].mxu0 }
 0x1de   : > { %v3697_v41 = vadd.f32 %v3664_v18, %v3494_v16  ;;  %v2395_v59 = vpop.f32.mrb[7].mxu0  ;;  %v2739_v4 = vmul.f32 %v3695_v36, %v3695_v36 }
 0x1df   : > { %v2698_v47 = vadd.f32 %v3696_v48, %v2697_v53  ;;  %v2737_v1 = vmul.f32 %v3696_v48, %v3696_v48  ;;  %v2767_v9 = vadd.f32 %v2766_v40, %v2736_v13  ;;  %v3698_v29 = vadd.f32 %v2395_v59, %v1351_v60 }
 0x1e0   : > { %v3153_v54 = vpack.c.bf16 %v3697_v41, %v3695_v36  ;;  %v2740_v8 = vmul.f32 %v3697_v41, %v3697_v41 }
 0x1e1   : > { %v2768_v24 = vadd.f32 %v2767_v9, %v2737_v1  ;;  %v3148_v32 = vpack.c.bf16 %v3698_v29, %v3696_v48  ;;  %v2699_v0 = vadd.f32 %v3698_v29, %v2698_v47  ;;  %v2738_v26 = vmul.f32 %v3698_v29, %v3698_v29 }
 0x1e2   : > { %3217 = vst [vmem:[%s4912_s16 + $0x18] sm:$0xff] %v3153_v54  }
 0x1e3   : > { %3216 = vst [vmem:[%s4912_s16 + $0x10] sm:$0xff] %v3148_v32   ;;  %v2700_v61 = vadd.f32 %v3695_v36, %v2699_v0  ;;  %v2769_v6 = vadd.f32 %v2768_v24, %v2738_v26  ;;  %v3667_v20 = vpop.f32.mrb[8].mxu0 }
 0x1e4   : > { %v3699_v10 = vadd.f32 %v3667_v20, %v3497_v31  ;;  %v2408_v56 = vpop.f32.mrb[9].mxu0 }
 0x1e5   : > { %v2770_v14 = vadd.f32 %v2769_v6, %v2739_v4  ;;  %v3700_v27 = vadd.f32 %v2408_v56, %v1364_v15  ;;  %v2701_v21 = vadd.f32 %v3697_v41, %v2700_v61  ;;  %v3668_v35 = vpop.f32.mrb[10].mxu0 }
 0x1e6   : > { %v3701_v49 = vadd.f32 %v3668_v35, %v3498_v11  ;;  %v2411_v55 = vpop.f32.mrb[11].mxu0  ;;  %v2743_v5 = vmul.f32 %v3699_v10, %v3699_v10 }
 0x1e7   : > { %v2702_v19 = vadd.f32 %v3700_v27, %v2701_v21  ;;  %v2741_v28 = vmul.f32 %v3700_v27, %v3700_v27  ;;  %v2771_v50 = vadd.f32 %v2770_v14, %v2740_v8  ;;  %v3702_v51 = vadd.f32 %v2411_v55, %v4898_v43 }
 0x1e8   : > { %v3163_v57 = vpack.c.bf16 %v3701_v49, %v3699_v10  ;;  %v2744_v3 = vmul.f32 %v3701_v49, %v3701_v49 }
 0x1e9   : > { %v2772_v30 = vadd.f32 %v2771_v50, %v2741_v28  ;;  %v3158_v16 = vpack.c.bf16 %v3702_v51, %v3700_v27  ;;  %v2703_v60 = vadd.f32 %v3702_v51, %v2702_v19  ;;  %v2742_v31 = vmul.f32 %v3702_v51, %v3702_v51 }
 0x1ea   : > { %3219 = vst [vmem:[%s4912_s16 + $0x28] sm:$0xff] %v3163_v57  }
 0x1eb   : > { %3218 = vst [vmem:[%s4912_s16 + $0x20] sm:$0xff] %v3158_v16   ;;  %v2704_v33 = vadd.f32 %v3699_v10, %v2703_v60  ;;  %v2773_v15 = vadd.f32 %v2772_v30, %v2742_v31  ;;  %v3671_v52 = vpop.f32.mrb[12].mxu0 }
 0x1ec   : > { %v3703_v23 = vadd.f32 %v3671_v52, %v4900_v37  ;;  %v2424_v11 = vpop.f32.mrb[13].mxu0 }
 0x1ed   : > { %v2774_v17 = vadd.f32 %v2773_v15, %v2743_v5  ;;  %v3704_v39 = vadd.f32 %v2424_v11, %v4902_v34  ;;  %v2705_v58 = vadd.f32 %v3701_v49, %v2704_v33  ;;  %v3672_v43 = vpop.f32.mrb[14].mxu0 }
 0x1ee   : > { %v3705_v7 = vadd.f32 %v3672_v43, %v4904_v38  ;;  %v2427_v12 = vpop.f32.mrb[15].mxu0  ;;  %v2747_v48 = vmul.f32 %v3703_v23, %v3703_v23 }
 0x1ef   : > { %v2706_v2 = vadd.f32 %v3704_v39, %v2705_v58  ;;  %v2745_v25 = vmul.f32 %v3704_v39, %v3704_v39  ;;  %v2775_v22 = vadd.f32 %v2774_v17, %v2744_v3  ;;  %v3706_v45 = vadd.f32 %v2427_v12, %v4907_v62 }
 0x1f0   : > { %v3539_v46 = vpop.f32.mrb[16].mxu1  ;;  %v3173_v42 = vpack.c.bf16 %v3705_v7, %v3703_v23  ;;  %v2748_v47 = vmul.f32 %v3705_v7, %v3705_v7 }
 0x1f1   : > { %v1608_v37 = vpop.f32.mrb[17].mxu1  ;;  %v2776_v44 = vadd.f32 %v2775_v22, %v2745_v25  ;;  %v3168_v36 = vpack.c.bf16 %v3706_v45, %v3704_v39  ;;  %v2707_v63 = vadd.f32 %v3706_v45, %v2706_v2  ;;  %v2746_v13 = vmul.f32 %v3706_v45, %v3706_v45 }
 0x1f2   : > { %v3540_v34 = vpop.f32.mrb[18].mxu1  ;;  %3221 = vst [vmem:[%s4912_s16 + $0x38] sm:$0xff] %v3173_v42  }
 0x1f3   : > { %v1611_v40 = vpop.f32.mrb[19].mxu1  ;;  %3220 = vst [vmem:[%s4912_s16 + $0x30] sm:$0xff] %v3168_v36   ;;  %v2708_v38 = vadd.f32 %v3703_v23, %v2707_v63  ;;  %v2777_v53 = vadd.f32 %v2776_v44, %v2746_v13  ;;  %v3675_v18 = vpop.f32.mrb[16].mxu0 }
 0x1f4   : > { %v3707_v41 = vadd.f32 %v3675_v18, %v3539_v46  ;;  %v2440_v59 = vpop.f32.mrb[17].mxu0 }
 0x1f5   : > { %v2778_v1 = vadd.f32 %v2777_v53, %v2747_v48  ;;  %v3708_v62 = vadd.f32 %v2440_v59, %v1608_v37  ;;  %v2709_v9 = vadd.f32 %v3705_v7, %v2708_v38  ;;  %v3676_v29 = vpop.f32.mrb[18].mxu0 }
 0x1f6   : > { %v3709_v54 = vadd.f32 %v3676_v29, %v3540_v34  ;;  %v2443_v24 = vpop.f32.mrb[19].mxu0  ;;  %v2751_v35 = vmul.f32 %v3707_v41, %v3707_v41 }
 0x1f7   : > { %v2710_v32 = vadd.f32 %v3708_v62, %v2709_v9  ;;  %v2749_v0 = vmul.f32 %v3708_v62, %v3708_v62  ;;  %v2779_v26 = vadd.f32 %v2778_v1, %v2748_v47  ;;  %v3710_v4 = vadd.f32 %v2443_v24, %v1611_v40 }
 0x1f8   : > { %v3543_v61 = vpop.f32.mrb[20].mxu1  ;;  %v3183_v6 = vpack.c.bf16 %v3709_v54, %v3707_v41  ;;  %v2752_v51 = vmul.f32 %v3709_v54, %v3709_v54 }
 0x1f9   : > { %v1624_v20 = vpop.f32.mrb[21].mxu1  ;;  %v2780_v10 = vadd.f32 %v2779_v26, %v2749_v0  ;;  %v3178_v56 = vpack.c.bf16 %v3710_v4, %v3708_v62  ;;  %v2711_v8 = vadd.f32 %v3710_v4, %v2710_v32  ;;  %v2750_v14 = vmul.f32 %v3710_v4, %v3710_v4 }
 0x1fa   : > { %v3544_v27 = vpop.f32.mrb[22].mxu1  ;;  %3223 = vst [vmem:[%s4912_s16 + $0x48] sm:$0xff] %v3183_v6  }
 0x1fb   : > { %v1627_v21 = vpop.f32.mrb[23].mxu1  ;;  %3222 = vst [vmem:[%s4912_s16 + $0x40] sm:$0xff] %v3178_v56   ;;  %v2712_v49 = vadd.f32 %v3707_v41, %v2711_v8  ;;  %v2781_v55 = vadd.f32 %v2780_v10, %v2750_v14  ;;  %v3679_v19 = vpop.f32.mrb[20].mxu0 }
 0x1fc   : > { %v3711_v28 = vadd.f32 %v3679_v19, %v3543_v61  ;;  %v2456_v50 = vpop.f32.mrb[21].mxu0 }
 0x1fd   : > { %v2782_v57 = vadd.f32 %v2781_v55, %v2751_v35  ;;  %v3712_v30 = vadd.f32 %v2456_v50, %v1624_v20  ;;  %v2713_v16 = vadd.f32 %v3709_v54, %v2712_v49  ;;  %v3680_v60 = vpop.f32.mrb[22].mxu0 }
 0x1fe   : > { %v3713_v31 = vadd.f32 %v3680_v60, %v3544_v27  ;;  %v2459_v5 = vpop.f32.mrb[23].mxu0  ;;  %v2755_v25 = vmul.f32 %v3711_v28, %v3711_v28 }
 0x1ff   : > { %v2714_v33 = vadd.f32 %v3712_v30, %v2713_v16  ;;  %v2753_v15 = vmul.f32 %v3712_v30, %v3712_v30  ;;  %v2783_v52 = vadd.f32 %v2782_v57, %v2752_v51  ;;  %v3714_v23 = vadd.f32 %v2459_v5, %v1627_v21 }
 0x200   : > { %v3547_v11 = vpop.f32.mrb[24].mxu1  ;;  %v3193_v3 = vpack.c.bf16 %v3713_v31, %v3711_v28  ;;  %v2756_v44 = vmul.f32 %v3713_v31, %v3713_v31 }
 0x201   : > { %v1640_v17 = vpop.f32.mrb[25].mxu1  ;;  %v2784_v39 = vadd.f32 %v2783_v52, %v2753_v15  ;;  %v3188_v58 = vpack.c.bf16 %v3714_v23, %v3712_v30  ;;  %v2715_v43 = vadd.f32 %v3714_v23, %v2714_v33  ;;  %v2754_v7 = vmul.f32 %v3714_v23, %v3714_v23 }
 0x202   : > { %v3548_v12 = vpop.f32.mrb[26].mxu1  ;;  %3225 = vst [vmem:[%s4912_s16 + $0x58] sm:$0xff] %v3193_v3  }
 0x203   : > { %v1643_v2 = vpop.f32.mrb[27].mxu1  ;;  %3224 = vst [vmem:[%s4912_s16 + $0x50] sm:$0xff] %v3188_v58   ;;  %v2716_v22 = vadd.f32 %v3711_v28, %v2715_v43  ;;  %v2785_v45 = vadd.f32 %v2784_v39, %v2754_v7  ;;  %v3683_v46 = vpop.f32.mrb[24].mxu0 }
 0x204   : > { %v3715_v42 = vadd.f32 %v3683_v46, %v3547_v11  ;;  %v2472_v37 = vpop.f32.mrb[25].mxu0 }
 0x205   : > { %v2786_v36 = vadd.f32 %v2785_v45, %v2755_v25  ;;  %v3716_v63 = vadd.f32 %v2472_v37, %v1640_v17  ;;  %v2717_v13 = vadd.f32 %v3713_v31, %v2716_v22  ;;  %v3684_v34 = vpop.f32.mrb[26].mxu0 }
 0x206   : > { %v3717_v40 = vadd.f32 %v3684_v34, %v3548_v12  ;;  %v2475_v48 = vpop.f32.mrb[27].mxu0  ;;  %v2759_v0 = vmul.f32 %v3715_v42, %v3715_v42 }
 0x207   : > { %v2718_v38 = vadd.f32 %v3716_v63, %v2717_v13  ;;  %v2757_v53 = vmul.f32 %v3716_v63, %v3716_v63  ;;  %v2787_v18 = vadd.f32 %v2786_v36, %v2756_v44  ;;  %v3718_v41 = vadd.f32 %v2475_v48, %v1643_v2 }
 0x208   : > { %v3551_v59 = vpop.f32.mrb[28].mxu1  ;;  %v3203_v47 = vpack.c.bf16 %v3717_v40, %v3715_v42  ;;  %v2760_v10 = vmul.f32 %v3717_v40, %v3717_v40 }
 0x209   : > { %v1656_v1 = vpop.f32.mrb[29].mxu1  ;;  %v2788_v62 = vadd.f32 %v2787_v18, %v2757_v53  ;;  %v3198_v9 = vpack.c.bf16 %v3718_v41, %v3716_v63  ;;  %v2719_v29 = vadd.f32 %v3718_v41, %v2718_v38  ;;  %v2758_v54 = vmul.f32 %v3718_v41, %v3718_v41 }
 0x20a   : > { %v3552_v24 = vpop.f32.mrb[30].mxu1  ;;  %3227 = vst [vmem:[%s4912_s16 + $0x68] sm:$0xff] %v3203_v47  }
 0x20b   : > { %v1659_v32 = vpop.f32.mrb[31].mxu1  ;;  %3226 = vst [vmem:[%s4912_s16 + $0x60] sm:$0xff] %v3198_v9   ;;  %v2720_v26 = vadd.f32 %v3715_v42, %v2719_v29  ;;  %v2789_v4 = vadd.f32 %v2788_v62, %v2758_v54  ;;  %v3687_v61 = vpop.f32.mrb[28].mxu0 }
 0x20c   : > { %v3719_v6 = vadd.f32 %v3687_v61, %v3551_v59  ;;  %v2488_v20 = vpop.f32.mrb[29].mxu0 }
 0x20d   : > { %v2790_v56 = vadd.f32 %v2789_v4, %v2759_v0  ;;  %v3720_v8 = vadd.f32 %v2488_v20, %v1656_v1  ;;  %v2721_v14 = vadd.f32 %v3717_v40, %v2720_v26  ;;  %v3688_v27 = vpop.f32.mrb[30].mxu0 }
 0x20e   : > { %v3721_v21 = vadd.f32 %v3688_v27, %v3552_v24  ;;  %v2491_v35 = vpop.f32.mrb[31].mxu0  ;;  %v2763_v60 = vmul.f32 %v3719_v6, %v3719_v6 }
 0x20f   : > { %v2722_v49 = vadd.f32 %v3720_v8, %v2721_v14  ;;  %v2761_v55 = vmul.f32 %v3720_v8, %v3720_v8  ;;  %v2791_v19 = vadd.f32 %v2790_v56, %v2760_v10  ;;  %v3722_v28 = vadd.f32 %v2491_v35, %v1659_v32 }
 0x210   : > { %v3213_v50 = vpack.c.bf16 %v3721_v21, %v3719_v6  ;;  %v2764_v33 = vmul.f32 %v3721_v21, %v3721_v21 }
 0x211   : > { %v2792_v51 = vadd.f32 %v2791_v19, %v2761_v55  ;;  %v3208_v57 = vpack.c.bf16 %v3722_v28, %v3720_v8  ;;  %v2723_v30 = vadd.f32 %v3722_v28, %v2722_v49  ;;  %v2762_v16 = vmul.f32 %v3722_v28, %v3722_v28 }
 0x212   : > { %3229 = vst [vmem:[%s4912_s16 + $0x78] sm:$0xff] %v3213_v50  }
 0x213   : > { %3228 = vst [vmem:[%s4912_s16 + $0x70] sm:$0xff] %v3208_v57   ;;  %v2724_v31 = vadd.f32 %v3719_v6, %v2723_v30  ;;  %v2793_v5 = vadd.f32 %v2792_v51, %v2762_v16 }
 0x215   : > { %v2725_v15 = vadd.f32 %v3721_v21, %v2724_v31  ;;  %v2794_v52 = vadd.f32 %v2793_v5, %v2763_v60 }
 0x217   : > { %v2726_v23 = vrot.slane %v2725_v15, 4  ;;  %v2795_v11 = vadd.f32 %v2794_v52, %v2764_v33 }
 0x219   : > { %v2727_v3 = vadd.f32 %v2726_v23, %v2725_v15  ;;  %v2796_v17 = vrot.slane %v2795_v11, 4 }
 0x21b   : > { %v2728_v39 = vrot.slane %v2727_v3, 2  ;;  %v2797_v58 = vadd.f32 %v2796_v17, %v2795_v11 }
 0x21d   : > { %v2729_v43 = vadd.f32 %v2728_v39, %v2727_v3  ;;  %v2798_v7 = vrot.slane %v2797_v58, 2 }
 0x21f   : > { %v2730_v12 = vrot.slane %v2729_v43, 1  ;;  %v2799_v2 = vadd.f32 %v2798_v7, %v2797_v58 }
 0x221   : > { %v2731_v25 = vadd.f32 %v2730_v12, %v2729_v43  ;;  %v2800_v22 = vrot.slane %v2799_v2, 1 }
 0x223   : > { %2732 = vst [vmem:[%s182_s19] sm:$0x1] %v2731_v25  ;;  %v2801_v45 = vadd.f32 %v2800_v22, %v2799_v2 }
 0x225   : > { %2802 = vst [vmem:[%s182_s19 + $0x1] sm:$0x1] %v2801_v45 }
 0x226 PF: > { %s14_s12 = sadd.s32 1, %s4008_s12  }
 0x227   : > { %p11_p5 = scmp.ge.s32.totalorder %s14_s12, 4  }
 0x229   :  { %13 = sbr.rel (!%p11_p5) target bundleno = 1 (0x1), region = 78 }

</bundles_post_ra>
